<compile_context>
chip_gen: v7x
topology: tpu7x:2x2x1
jax: 0.10.0
libtpu: 0.0.40
codegen_flags: <defaults>
</compile_context>

<pallas_src>
import functools

import jax
import jax.numpy as jnp
from jax.experimental import pallas as pl
from jax.experimental.pallas import tpu as pltpu


def _round_up(x, m):
    return ((x + m - 1) // m) * m


def _attention_pool_kernel(x_ref, pos0_ref, posr_ref, sel_ref, exp_ref,
                           wq_ref, bq_ref, wk_ref, bk_ref, wv_ref, bv_ref,
                           wc_ref, bc_ref, o_ref, *, num_heads, seq_valid):
    # x_ref:   (bb, hw_pad, C) f32  spatial tokens (rows >= HW are zero-padded)
    # pos0_ref:(1, C)  f32          positional embedding of the pooled token
    # posr_ref:(hw_pad, C) f32      pos[1:] rows, pos[0] at row HW, zero pad
    # sel_ref: (C, nh) f32          head-selector 0/1 matrix
    # exp_ref: (nh, C) f32          head-expander 0/1 matrix
    # w*_ref:  (C, C)/(C, out_pad) bf16  pre-transposed Linear weights (in, out)
    #          (head_dim**-0.5 pre-folded into wq/bq)
    # b*_ref:  (1, C)/(1, out_pad) f32
    # o_ref:   (bb, out_pad) f32
    bb, hw_pad, c = x_ref.shape
    nh = num_heads
    hw = seq_valid - 1                                   # number of spatial tokens

    x = x_ref[...]                                       # (bb, hw_pad, C) f32

    # pooled (mean) token per image; padded rows are zero so sum/HW is exact
    mean_tok = jnp.sum(x, axis=1) * (1.0 / hw)           # (bb, C)

    # token block: rows 0..hw-1 spatial (+pos[1:]), row hw = mean (+pos[0],
    # already baked into posr_ref), rows > hw are padding (masked from softmax)
    row_c = jax.lax.broadcasted_iota(jnp.int32, (hw_pad, c), 0)
    is_mean = (row_c == hw).astype(jnp.float32)          # (hw_pad, C)
    tokens = x + posr_ref[...] + is_mean * mean_tok[:, None, :]
    tok2d = tokens.astype(jnp.bfloat16).reshape(bb * hw_pad, c)   # free reshape

    # q projection: only the pooled token is a query (scale folded into wq/bq)
    q_in = (mean_tok + pos0_ref[...]).astype(jnp.bfloat16)        # (bb, C)
    q0 = jnp.dot(q_in, wq_ref[...],
                 preferred_element_type=jnp.float32) + bq_ref[...]  # (bb, C)

    # k/v projections: one stacked-row bf16 matmul each (mean token folded in)
    k = (jnp.dot(tok2d, wk_ref[...], preferred_element_type=jnp.float32)
         + bk_ref[...]).reshape(bb, hw_pad, c)
    v = (jnp.dot(tok2d, wv_ref[...], preferred_element_type=jnp.float32)
         + bv_ref[...]).reshape(bb, hw_pad, c)

    # per-head scores via the head-selector matmul (f32 for accuracy)
    prod = k * q0[:, None, :]                                     # (bb, hw_pad, C)
    s = jnp.dot(prod.reshape(bb * hw_pad, c), sel_ref[...],
                preferred_element_type=jnp.float32
                ).reshape(bb, hw_pad, nh)                         # (bb, hw_pad, nh)

    # softmax over the seq_valid real keys; padded rows get zero weight
    row_h = jax.lax.broadcasted_iota(jnp.int32, (hw_pad, nh), 0)
    valid = (row_h < seq_valid).astype(jnp.float32)               # (hw_pad, nh)
    m = jnp.max(s, axis=1)                                        # (bb, nh)
    p = jnp.exp(s - m[:, None, :]) * valid
    inv = pl.reciprocal(jnp.sum(p, axis=1), approx=True)          # EUP slot
    w = p * inv[:, None, :]                                       # (bb, hw_pad, nh)

    # broadcast per-head weights back to all C lanes, reduce over the keys
    wfull = jnp.dot(w.reshape(bb * hw_pad, nh), exp_ref[...],
                    preferred_element_type=jnp.float32).reshape(bb, hw_pad, c)
    attn = jnp.sum(wfull * v, axis=1)                             # (bb, C)

    # output projection (c_proj); lane- and sublane-dense 2-D store
    o_ref[...] = (jnp.dot(attn.astype(jnp.bfloat16), wc_ref[...],
                          preferred_element_type=jnp.float32) + bc_ref[...])


def _pick_batch_block(n, rows_per_image, target_rows=512):
    # Largest divisor of n whose stacked rows (bb * rows_per_image) stay near
    # the MXU-friendly target.  No forced minimum grid length (v5e/v6e have one
    # TensorCore; extra steps only add per-step overhead).  Prefer bb == n or
    # bb % 8 == 0 so the (bb, out_pad) output block stores sublane-dense.
    cap = max(1, target_rows // max(rows_per_image, 1))
    divisors = [d for d in range(1, n + 1) if n % d == 0 and d <= cap]
    if not divisors:
        return 1
    dense = [d for d in divisors if d == n or d % 8 == 0]
    return max(dense) if dense else max(divisors)


def _vmem_limit_bytes(bb, hw_pad, c, out_pad, nh):
    weights = 2 * (3 * c * c + c * out_pad)                 # bf16, single-buffered
    consts = 4 * (4 * c + out_pad + hw_pad * c + 2 * c * nh)
    x_blk = 2 * 4 * bb * hw_pad * c                         # f32 input, double-buffered
    o_blk = 2 * 4 * bb * out_pad
    interm = 8 * 4 * bb * hw_pad * c                        # tokens/k/v/prod/wfull f32
    est = int(1.4 * (weights + consts + x_blk + o_blk + interm)) + (4 << 20)
    try:
        phys = pltpu.get_tpu_info().vmem_capacity_bytes
    except Exception:
        phys = 64 * 1024 * 1024                             # conservative fallback
    cap = int(phys * 0.85)                                  # leave compiler headroom
    return max(min(est, cap), 32 * 1024 * 1024)


def prepare_attention_pool_params(pos, wq, bq, wk, bk, wv, bv, wc, bc, *, num_heads):
    """One-time weight prep (transpose / cast / pad / fold softmax scale).

    Keep this out of the hot path: at production C the per-call transposes cost
    more HBM traffic than the kernel itself.
    """
    seq_len, c = pos.shape                                  # seq_len = HW + 1
    hw = seq_len - 1
    assert c % num_heads == 0
    head_dim = c // num_heads
    scale = head_dim ** -0.5
    out_dim = wc.shape[0]
    out_pad = _round_up(out_dim, 128)
    hw_pad = _round_up(seq_len, 8)                          # room for the mean row

    params = dict(
        wq=(wq * scale).T.astype(jnp.bfloat16),
        wk=wk.T.astype(jnp.bfloat16),
        wv=wv.T.astype(jnp.bfloat16),
        wc=jnp.pad(wc.T.astype(jnp.bfloat16), ((0, 0), (0, out_pad - out_dim))),
        bq=(bq * scale).reshape(1, c).astype(jnp.float32),
        bk=bk.reshape(1, c).astype(jnp.float32),
        bv=bv.reshape(1, c).astype(jnp.float32),
        bc=jnp.pad(bc.astype(jnp.float32), (0, out_pad - out_dim)).reshape(1, out_pad),
        pos0=pos[0:1].astype(jnp.float32),
        # rows 0..HW-1: pos[1:]; row HW: pos[0] (mean-token row); rest: zero pad
        posr=jnp.concatenate(
            [pos[1:].astype(jnp.float32), pos[0:1].astype(jnp.float32),
             jnp.zeros((hw_pad - seq_len, c), jnp.float32)], axis=0),
    )
    # head-selector (C, nh) and head-expander (nh, C) 0/1 matrices (f32 score path)
    head_of = jnp.arange(c, dtype=jnp.int32) // head_dim
    sel = (head_of[:, None] == jnp.arange(num_heads, dtype=jnp.int32)[None, :])
    params["sel"] = sel.astype(jnp.float32)
    params["expand"] = sel.T.astype(jnp.float32)
    params["out_dim"] = out_dim
    params["seq_valid"] = seq_len
    params["hw_pad"] = hw_pad
    return params


def attention_pool2d(x_nchw, params, *, num_heads):
    """x_nchw: (N, C, H, W) float32; params from prepare_attention_pool_params."""
    N, C, H, W = x_nchw.shape
    HW = H * W
    assert params["seq_valid"] == HW + 1, "spatial size does not match pos embedding"
    hw_pad = params["hw_pad"]
    out_dim = params["out_dim"]
    out_pad = params["wc"].shape[1]

    # NCHW -> (N, HW, C) channels-last, zero-padded to hw_pad rows (row HW will
    # receive the pooled mean token inside the kernel).
    # TODO(synk): fold this relayout into the upstream producer (or do the
    # transpose in-kernel) on memory-bound generations; it is one extra HBM pass.
    x_seq = jnp.transpose(x_nchw.reshape(N, C, HW), (0, 2, 1)).astype(jnp.float32)
    x_seq = jnp.pad(x_seq, ((0, 0), (0, hw_pad - HW), (0, 0)))

    bb = _pick_batch_block(N, hw_pad)
    assert N % bb == 0
    grid = (N // bb,)

    kernel = functools.partial(_attention_pool_kernel,
                               num_heads=num_heads, seq_valid=HW + 1)

    const2d = lambda b: (0, 0)
    # grid-invariant operands: constant index_map + single buffer (Buffered(1))
    csp = lambda shape: pl.BlockSpec(shape, const2d, pipeline_mode=pl.Buffered(1))

    out = pl.pallas_call(
        kernel,
        out_shape=jax.ShapeDtypeStruct((N, out_pad), jnp.float32),
        grid=grid,
        in_specs=[
            pl.BlockSpec((bb, hw_pad, C), lambda b: (b, 0, 0)),   # x batch block
            csp((1, C)),                                          # pos[0]
            csp((hw_pad, C)),                                     # padded pos rows
            csp((C, num_heads)),                                  # head selector
            csp((num_heads, C)),                                  # head expander
            csp((C, C)), csp((1, C)),                             # Wq^T (scaled), bq
            csp((C, C)), csp((1, C)),                             # Wk^T, bk
            csp((C, C)), csp((1, C)),                             # Wv^T, bv
            csp((C, out_pad)), csp((1, out_pad)),                 # Wc^T, bc (padded)
        ],
        out_specs=pl.BlockSpec((bb, out_pad), lambda b: (b, 0)),
        compiler_params=pltpu.CompilerParams(
            dimension_semantics=("parallel",),
            vmem_limit_bytes=_vmem_limit_bytes(bb, hw_pad, C, out_pad, num_heads),
        ),
    )(x_seq, params["pos0"], params["posr"], params["sel"], params["expand"],
      params["wq"], params["bq"], params["wk"], params["bk"],
      params["wv"], params["bv"], params["wc"], params["bc"])
    return out[:, :out_dim]


def attention_pool2d_reference(x_nchw, pos, wq, bq, wk, bk, wv, bv, wc, bc, *, num_heads):
    """Pure-JAX f32 reference mirroring the PyTorch forward exactly."""
    N, C, H, W = x_nchw.shape
    xs = x_nchw.reshape(N, C, H * W).transpose(2, 0, 1)                 # (HW, N, C)
    xs = jnp.concatenate([xs.mean(axis=0, keepdims=True), xs], axis=0)  # (L, N, C)
    xs = xs + pos[:, None, :]
    L = xs.shape[0]
    head_dim = C // num_heads

    q = xs[0:1] @ wq.T + bq                                             # (1, N, C)
    k = xs @ wk.T + bk                                                  # (L, N, C)
    v = xs @ wv.T + bv
    q = q * (head_dim ** -0.5)

    qh = q.reshape(1, N, num_heads, head_dim)
    kh = k.reshape(L, N, num_heads, head_dim)
    vh = v.reshape(L, N, num_heads, head_dim)
    s = jnp.einsum('qnhd,knhd->nhqk', qh, kh)
    p = jax.nn.softmax(s, axis=-1)
    o = jnp.einsum('nhqk,knhd->qnhd', p, vh).reshape(1, N, C)
    out = o @ wc.T + bc                                                 # (1, N, out_dim)
    return out[0]


if __name__ == "__main__":
    # small, module-consistent shapes (exercises HW padding: L = 17 -> hw_pad = 24)
    N = 8
    spacial_dim = 4            # HW = 16, L = 17
    embed_dim = 32
    num_heads = 4
    output_dim = 16

    key = jax.random.PRNGKey(0)
    keys = jax.random.split(key, 10)

    pos = (jax.random.normal(keys[0], (spacial_dim ** 2 + 1, embed_dim), jnp.float32)
           / embed_dim ** 0.5)

    def make_linear(kw, kb, out_f, in_f):
        w = jax.random.normal(kw, (out_f, in_f), jnp.float32) * (1.0 / in_f ** 0.5)
        b = jax.random.normal(kb, (out_f,), jnp.float32) * 0.02
        return w, b

    wq, bq = make_linear(keys[1], keys[2], embed_dim, embed_dim)
    wk, bk = make_linear(keys[3], keys[4], embed_dim, embed_dim)
    wv, bv = make_linear(keys[5], keys[6], embed_dim, embed_dim)
    wc, bc = make_linear(keys[7], keys[8], output_dim, embed_dim)

    x = jax.random.normal(keys[9], (N, embed_dim, spacial_dim, spacial_dim), jnp.float32)

    # one-time weight prep (out of the hot path), then run the kernel
    params = prepare_attention_pool_params(pos, wq, bq, wk, bk, wv, bv, wc, bc,
                                           num_heads=num_heads)
    out = attention_pool2d(x, params, num_heads=num_heads)
    out = jax.block_until_ready(out)

    ref = attention_pool2d_reference(x, pos, wq, bq, wk, bk, wv, bv, wc, bc,
                                     num_heads=num_heads)
    assert out.shape == (N, output_dim)
    # bf16 projection operands (f32 accumulation, f32 score/softmax path)
    assert jnp.allclose(out, ref, rtol=2e-2, atol=2e-2), (out, ref)

    print("KERNEL_OK")
</pallas_src>

<mosaic_0001>
module attributes {stable_mosaic.version = 11 : i64} {
  func.func @_attention_pool_kernel(%arg0: i32, %arg1: memref<8x24x32xf32, #tpu.memory_space<vmem>>, %arg2: memref<1x32xf32, #tpu.memory_space<vmem>>, %arg3: memref<24x32xf32, #tpu.memory_space<vmem>>, %arg4: memref<32x4xf32, #tpu.memory_space<vmem>>, %arg5: memref<4x32xf32, #tpu.memory_space<vmem>>, %arg6: memref<32x32xbf16, #tpu.memory_space<vmem>>, %arg7: memref<1x32xf32, #tpu.memory_space<vmem>>, %arg8: memref<32x32xbf16, #tpu.memory_space<vmem>>, %arg9: memref<1x32xf32, #tpu.memory_space<vmem>>, %arg10: memref<32x32xbf16, #tpu.memory_space<vmem>>, %arg11: memref<1x32xf32, #tpu.memory_space<vmem>>, %arg12: memref<32x128xbf16, #tpu.memory_space<vmem>>, %arg13: memref<1x128xf32, #tpu.memory_space<vmem>>, %arg14: memref<8x128xf32, #tpu.memory_space<vmem>>) attributes {dimension_semantics = [#tpu.dimension_semantics<parallel>], iteration_bounds = array<i64: 1>, scalar_prefetch = 0 : i64, scratch_operands = 0 : i64, tpu.core_type = #tpu.core_type<tc>, window_params = [{transform_indices = @transform_0, window_bounds = array<i64: 8, 24, 32>}, {pipeline_mode = #tpu.pipeline_mode<synchronous>, transform_indices = @transform_1, window_bounds = array<i64: 1, 32>}, {pipeline_mode = #tpu.pipeline_mode<synchronous>, transform_indices = @transform_2, window_bounds = array<i64: 24, 32>}, {pipeline_mode = #tpu.pipeline_mode<synchronous>, transform_indices = @transform_3, window_bounds = array<i64: 32, 4>}, {pipeline_mode = #tpu.pipeline_mode<synchronous>, transform_indices = @transform_4, window_bounds = array<i64: 4, 32>}, {pipeline_mode = #tpu.pipeline_mode<synchronous>, transform_indices = @transform_5, window_bounds = array<i64: 32, 32>}, {pipeline_mode = #tpu.pipeline_mode<synchronous>, transform_indices = @transform_6, window_bounds = array<i64: 1, 32>}, {pipeline_mode = #tpu.pipeline_mode<synchronous>, transform_indices = @transform_7, window_bounds = array<i64: 32, 32>}, {pipeline_mode = #tpu.pipeline_mode<synchronous>, transform_indices = @transform_8, window_bounds = array<i64: 1, 32>}, {pipeline_mode = #tpu.pipeline_mode<synchronous>, transform_indices = @transform_9, window_bounds = array<i64: 32, 32>}, {pipeline_mode = #tpu.pipeline_mode<synchronous>, transform_indices = @transform_10, window_bounds = array<i64: 1, 32>}, {pipeline_mode = #tpu.pipeline_mode<synchronous>, transform_indices = @transform_11, window_bounds = array<i64: 32, 128>}, {pipeline_mode = #tpu.pipeline_mode<synchronous>, transform_indices = @transform_12, window_bounds = array<i64: 1, 128>}, {transform_indices = @transform_13, window_bounds = array<i64: 8, 128>}]} {
    %c0 = arith.constant 0 : index
    %c0_0 = arith.constant 0 : index
    %c0_1 = arith.constant 0 : index
    %0 = vector.load %arg1[%c0, %c0_0, %c0_1] : memref<8x24x32xf32, #tpu.memory_space<vmem>>, vector<8x24x32xf32>
    %cst = arith.constant dense<0.000000e+00> : vector<8x32xf32>
    %1 = vector.multi_reduction <add>, %0, %cst [1] : vector<8x24x32xf32> to vector<8x32xf32>
    %cst_2 = arith.constant 6.250000e-02 : f32
    %2 = vector.broadcast %cst_2 : f32 to vector<8x32xf32>
    %3 = arith.mulf %1, %2 : vector<8x32xf32>
    %4 = tpu.iota {dimensions = array<i32: 0>} : vector<24x32xi32>
    %c16_i32 = arith.constant 16 : i32
    %5 = vector.broadcast %c16_i32 : i32 to vector<24x32xi32>
    %6 = arith.cmpi eq, %4, %5 : vector<24x32xi32>
    %7 = arith.extui %6 : vector<24x32xi1> to vector<24x32xi32>
    %8 = arith.sitofp %7 : vector<24x32xi32> to vector<24x32xf32>
    %c0_3 = arith.constant 0 : index
    %c0_4 = arith.constant 0 : index
    %9 = vector.load %arg3[%c0_3, %c0_4] : memref<24x32xf32, #tpu.memory_space<vmem>>, vector<24x32xf32>
    %10 = vector.shape_cast %9 : vector<24x32xf32> to vector<1x24x32xf32>
    %11 = vector.broadcast %10 : vector<1x24x32xf32> to vector<8x24x32xf32>
    %12 = arith.addf %0, %11 : vector<8x24x32xf32>
    %13 = vector.shape_cast %3 : vector<8x32xf32> to vector<8x1x32xf32>
    %14 = vector.shape_cast %8 : vector<24x32xf32> to vector<1x24x32xf32>
    %15 = vector.broadcast %14 : vector<1x24x32xf32> to vector<8x24x32xf32>
    %16 = vector.broadcast %13 : vector<8x1x32xf32> to vector<8x24x32xf32>
    %17 = arith.mulf %15, %16 : vector<8x24x32xf32>
    %18 = arith.addf %12, %17 : vector<8x24x32xf32>
    %19 = arith.truncf %18 : vector<8x24x32xf32> to vector<8x24x32xbf16>
    %20 = vector.shape_cast %19 : vector<8x24x32xbf16> to vector<192x32xbf16>
    %c0_5 = arith.constant 0 : index
    %c0_6 = arith.constant 0 : index
    %21 = vector.load %arg2[%c0_5, %c0_6] : memref<1x32xf32, #tpu.memory_space<vmem>>, vector<1x32xf32>
    %22 = vector.broadcast %21 : vector<1x32xf32> to vector<8x32xf32>
    %23 = arith.addf %3, %22 : vector<8x32xf32>
    %24 = arith.truncf %23 : vector<8x32xf32> to vector<8x32xbf16>
    %c0_7 = arith.constant 0 : index
    %c0_8 = arith.constant 0 : index
    %25 = vector.load %arg6[%c0_7, %c0_8] : memref<32x32xbf16, #tpu.memory_space<vmem>>, vector<32x32xbf16>
    %cst_9 = arith.constant dense<0.000000e+00> : vector<8x32xf32>
    %26 = tpu.matmul %24, %25, %cst_9 {dimension_numbers = #tpu.dot_dimension_numbers<[1], [0], [0], [1], [0, 0, 1, 1], [], []>} : vector<8x32xbf16>, vector<32x32xbf16>, vector<8x32xf32> -> vector<8x32xf32>
    %c0_10 = arith.constant 0 : index
    %c0_11 = arith.constant 0 : index
    %27 = vector.load %arg7[%c0_10, %c0_11] : memref<1x32xf32, #tpu.memory_space<vmem>>, vector<1x32xf32>
    %28 = vector.broadcast %27 : vector<1x32xf32> to vector<8x32xf32>
    %29 = arith.addf %26, %28 : vector<8x32xf32>
    %c0_12 = arith.constant 0 : index
    %c0_13 = arith.constant 0 : index
    %30 = vector.load %arg8[%c0_12, %c0_13] : memref<32x32xbf16, #tpu.memory_space<vmem>>, vector<32x32xbf16>
    %cst_14 = arith.constant dense<0.000000e+00> : vector<192x32xf32>
    %31 = tpu.matmul %20, %30, %cst_14 {dimension_numbers = #tpu.dot_dimension_numbers<[1], [0], [0], [1], [0, 0, 1, 1], [], []>} : vector<192x32xbf16>, vector<32x32xbf16>, vector<192x32xf32> -> vector<192x32xf32>
    %c0_15 = arith.constant 0 : index
    %c0_16 = arith.constant 0 : index
    %32 = vector.load %arg9[%c0_15, %c0_16] : memref<1x32xf32, #tpu.memory_space<vmem>>, vector<1x32xf32>
    %33 = vector.broadcast %32 : vector<1x32xf32> to vector<192x32xf32>
    %34 = arith.addf %31, %33 : vector<192x32xf32>
    %35 = vector.shape_cast %34 : vector<192x32xf32> to vector<8x24x32xf32>
    %c0_17 = arith.constant 0 : index
    %c0_18 = arith.constant 0 : index
    %36 = vector.load %arg10[%c0_17, %c0_18] : memref<32x32xbf16, #tpu.memory_space<vmem>>, vector<32x32xbf16>
    %cst_19 = arith.constant dense<0.000000e+00> : vector<192x32xf32>
    %37 = tpu.matmul %20, %36, %cst_19 {dimension_numbers = #tpu.dot_dimension_numbers<[1], [0], [0], [1], [0, 0, 1, 1], [], []>} : vector<192x32xbf16>, vector<32x32xbf16>, vector<192x32xf32> -> vector<192x32xf32>
    %c0_20 = arith.constant 0 : index
    %c0_21 = arith.constant 0 : index
    %38 = vector.load %arg11[%c0_20, %c0_21] : memref<1x32xf32, #tpu.memory_space<vmem>>, vector<1x32xf32>
    %39 = vector.broadcast %38 : vector<1x32xf32> to vector<192x32xf32>
    %40 = arith.addf %37, %39 : vector<192x32xf32>
    %41 = vector.shape_cast %40 : vector<192x32xf32> to vector<8x24x32xf32>
    %42 = vector.shape_cast %29 : vector<8x32xf32> to vector<8x1x32xf32>
    %43 = vector.broadcast %42 : vector<8x1x32xf32> to vector<8x24x32xf32>
    %44 = arith.mulf %35, %43 : vector<8x24x32xf32>
    %45 = vector.shape_cast %44 : vector<8x24x32xf32> to vector<192x32xf32>
    %c0_22 = arith.constant 0 : index
    %c0_23 = arith.constant 0 : index
    %46 = vector.load %arg4[%c0_22, %c0_23] : memref<32x4xf32, #tpu.memory_space<vmem>>, vector<32x4xf32>
    %cst_24 = arith.constant dense<0.000000e+00> : vector<192x4xf32>
    %47 = tpu.matmul %45, %46, %cst_24 {dimension_numbers = #tpu.dot_dimension_numbers<[1], [0], [0], [1], [0, 0, 1, 1], [], []>} : vector<192x32xf32>, vector<32x4xf32>, vector<192x4xf32> -> vector<192x4xf32>
    %48 = vector.shape_cast %47 : vector<192x4xf32> to vector<8x24x4xf32>
    %49 = tpu.iota {dimensions = array<i32: 0>} : vector<24x4xi32>
    %c17_i32 = arith.constant 17 : i32
    %50 = vector.broadcast %c17_i32 : i32 to vector<24x4xi32>
    %51 = arith.cmpi slt, %49, %50 : vector<24x4xi32>
    %52 = arith.extui %51 : vector<24x4xi1> to vector<24x4xi32>
    %53 = arith.sitofp %52 : vector<24x4xi32> to vector<24x4xf32>
    %cst_25 = arith.constant dense<0xFF800000> : vector<8x4xf32>
    %54 = vector.multi_reduction <maximumf>, %48, %cst_25 [1] : vector<8x24x4xf32> to vector<8x4xf32>
    %55 = vector.shape_cast %54 : vector<8x4xf32> to vector<8x1x4xf32>
    %56 = vector.broadcast %55 : vector<8x1x4xf32> to vector<8x24x4xf32>
    %57 = arith.subf %48, %56 : vector<8x24x4xf32>
    %58 = math.exp %57 : vector<8x24x4xf32>
    %59 = vector.shape_cast %53 : vector<24x4xf32> to vector<1x24x4xf32>
    %60 = vector.broadcast %59 : vector<1x24x4xf32> to vector<8x24x4xf32>
    %61 = arith.mulf %58, %60 : vector<8x24x4xf32>
    %cst_26 = arith.constant dense<0.000000e+00> : vector<8x4xf32>
    %62 = vector.multi_reduction <add>, %61, %cst_26 [1] : vector<8x24x4xf32> to vector<8x4xf32>
    %63 = tpu.reciprocal %62 {approx = true} : vector<8x4xf32> -> vector<8x4xf32>
    %64 = vector.shape_cast %63 : vector<8x4xf32> to vector<8x1x4xf32>
    %65 = vector.broadcast %64 : vector<8x1x4xf32> to vector<8x24x4xf32>
    %66 = arith.mulf %61, %65 : vector<8x24x4xf32>
    %67 = vector.shape_cast %66 : vector<8x24x4xf32> to vector<192x4xf32>
    %c0_27 = arith.constant 0 : index
    %c0_28 = arith.constant 0 : index
    %68 = vector.load %arg5[%c0_27, %c0_28] : memref<4x32xf32, #tpu.memory_space<vmem>>, vector<4x32xf32>
    %cst_29 = arith.constant dense<0.000000e+00> : vector<192x32xf32>
    %69 = tpu.matmul %67, %68, %cst_29 {dimension_numbers = #tpu.dot_dimension_numbers<[1], [0], [0], [1], [0, 0, 1, 1], [], []>} : vector<192x4xf32>, vector<4x32xf32>, vector<192x32xf32> -> vector<192x32xf32>
    %70 = vector.shape_cast %69 : vector<192x32xf32> to vector<8x24x32xf32>
    %71 = arith.mulf %70, %41 : vector<8x24x32xf32>
    %cst_30 = arith.constant dense<0.000000e+00> : vector<8x32xf32>
    %72 = vector.multi_reduction <add>, %71, %cst_30 [1] : vector<8x24x32xf32> to vector<8x32xf32>
    %73 = arith.truncf %72 : vector<8x32xf32> to vector<8x32xbf16>
    %c0_31 = arith.constant 0 : index
    %c0_32 = arith.constant 0 : index
    %74 = vector.load %arg12[%c0_31, %c0_32] : memref<32x128xbf16, #tpu.memory_space<vmem>>, vector<32x128xbf16>
    %cst_33 = arith.constant dense<0.000000e+00> : vector<8x128xf32>
    %75 = tpu.matmul %73, %74, %cst_33 {dimension_numbers = #tpu.dot_dimension_numbers<[1], [0], [0], [1], [0, 0, 1, 1], [], []>} : vector<8x32xbf16>, vector<32x128xbf16>, vector<8x128xf32> -> vector<8x128xf32>
    %c0_34 = arith.constant 0 : index
    %c0_35 = arith.constant 0 : index
    %76 = vector.load %arg13[%c0_34, %c0_35] : memref<1x128xf32, #tpu.memory_space<vmem>>, vector<1x128xf32>
    %77 = vector.broadcast %76 : vector<1x128xf32> to vector<8x128xf32>
    %78 = arith.addf %75, %77 : vector<8x128xf32>
    %c0_36 = arith.constant 0 : index
    %c0_37 = arith.constant 0 : index
    %79 = vector.load %arg14[%c0_36, %c0_37] : memref<8x128xf32, #tpu.memory_space<vmem>>, vector<8x128xf32>
    tpu.vector_store %arg14[%c0_36, %c0_37], %78 {strides = array<i32>} : memref<8x128xf32, #tpu.memory_space<vmem>>, vector<8x128xf32>,
    return
  }
  func.func @transform_0(%arg0: i32) -> (i32, i32, i32) {
    %c0_i32 = arith.constant 0 : i32
    %c0_i32_0 = arith.constant 0 : i32
    %c0_i32_1 = arith.constant 0 : i32
    return %arg0, %c0_i32, %c0_i32_0 : i32, i32, i32
  }
  func.func @transform_1(%arg0: i32) -> (i32, i32) {
    %c0_i32 = arith.constant 0 : i32
    %c0_i32_0 = arith.constant 0 : i32
    %c0_i32_1 = arith.constant 0 : i32
    return %c0_i32, %c0_i32_0 : i32, i32
  }
  func.func @transform_2(%arg0: i32) -> (i32, i32) {
    %c0_i32 = arith.constant 0 : i32
    %c0_i32_0 = arith.constant 0 : i32
    %c0_i32_1 = arith.constant 0 : i32
    return %c0_i32, %c0_i32_0 : i32, i32
  }
  func.func @transform_3(%arg0: i32) -> (i32, i32) {
    %c0_i32 = arith.constant 0 : i32
    %c0_i32_0 = arith.constant 0 : i32
    %c0_i32_1 = arith.constant 0 : i32
    return %c0_i32, %c0_i32_0 : i32, i32
  }
  func.func @transform_4(%arg0: i32) -> (i32, i32) {
    %c0_i32 = arith.constant 0 : i32
    %c0_i32_0 = arith.constant 0 : i32
    %c0_i32_1 = arith.constant 0 : i32
    return %c0_i32, %c0_i32_0 : i32, i32
  }
  func.func @transform_5(%arg0: i32) -> (i32, i32) {
    %c0_i32 = arith.constant 0 : i32
    %c0_i32_0 = arith.constant 0 : i32
    %c0_i32_1 = arith.constant 0 : i32
    return %c0_i32, %c0_i32_0 : i32, i32
  }
  func.func @transform_6(%arg0: i32) -> (i32, i32) {
    %c0_i32 = arith.constant 0 : i32
    %c0_i32_0 = arith.constant 0 : i32
    %c0_i32_1 = arith.constant 0 : i32
    return %c0_i32, %c0_i32_0 : i32, i32
  }
  func.func @transform_7(%arg0: i32) -> (i32, i32) {
    %c0_i32 = arith.constant 0 : i32
    %c0_i32_0 = arith.constant 0 : i32
    %c0_i32_1 = arith.constant 0 : i32
    return %c0_i32, %c0_i32_0 : i32, i32
  }
  func.func @transform_8(%arg0: i32) -> (i32, i32) {
    %c0_i32 = arith.constant 0 : i32
    %c0_i32_0 = arith.constant 0 : i32
    %c0_i32_1 = arith.constant 0 : i32
    return %c0_i32, %c0_i32_0 : i32, i32
  }
  func.func @transform_9(%arg0: i32) -> (i32, i32) {
    %c0_i32 = arith.constant 0 : i32
    %c0_i32_0 = arith.constant 0 : i32
    %c0_i32_1 = arith.constant 0 : i32
    return %c0_i32, %c0_i32_0 : i32, i32
  }
  func.func @transform_10(%arg0: i32) -> (i32, i32) {
    %c0_i32 = arith.constant 0 : i32
    %c0_i32_0 = arith.constant 0 : i32
    %c0_i32_1 = arith.constant 0 : i32
    return %c0_i32, %c0_i32_0 : i32, i32
  }
  func.func @transform_11(%arg0: i32) -> (i32, i32) {
    %c0_i32 = arith.constant 0 : i32
    %c0_i32_0 = arith.constant 0 : i32
    %c0_i32_1 = arith.constant 0 : i32
    return %c0_i32, %c0_i32_0 : i32, i32
  }
  func.func @transform_12(%arg0: i32) -> (i32, i32) {
    %c0_i32 = arith.constant 0 : i32
    %c0_i32_0 = arith.constant 0 : i32
    %c0_i32_1 = arith.constant 0 : i32
    return %c0_i32, %c0_i32_0 : i32, i32
  }
  func.func @transform_13(%arg0: i32) -> (i32, i32) {
    %c0_i32 = arith.constant 0 : i32
    %c0_i32_0 = arith.constant 0 : i32
    return %arg0, %c0_i32 : i32, i32
  }
}

</mosaic_0001>

<bundles_post_ra>
// kernel: tpu_custom_call.1
= control target key start
LH: loop header
LB: loop body
LE: loop exit
PB: predicated region body
PF: predicated region fallthrough
CT: control target
= control target key end

     0   :  { %18 = vsyncpa [#allocation3], 0  ;;  %s3525_s0 = inlined_call_operand.hbm [shape: f32[8,24,32], index: 0, kind: input, shape index: {}]   ;;  %s3526_s1 = inlined_call_operand.vmem [shape: f32[1,32], index: 1, kind: input, shape index: {}]   ;;  %s3527_s2 = inlined_call_operand.vmem [shape: f32[24,32], index: 2, kind: input, shape index: {}]   ;;  %s3528_s3 = inlined_call_operand.vmem [shape: f32[32,4], index: 3, kind: input, shape index: {}]   ;;  %s3529_s4 = inlined_call_operand.hbm [shape: f32[4,32], index: 4, kind: input, shape index: {}]   ;;  %s3530_s5 = inlined_call_operand.vmem [shape: bf16[32,32], index: 5, kind: input, shape index: {}]   ;;  %s3531_s6 = inlined_call_operand.hbm [shape: f32[1,32], index: 6, kind: input, shape index: {}]   ;;  %s3532_s7 = inlined_call_operand.vmem [shape: bf16[32,32], index: 7, kind: input, shape index: {}]   ;;  %s3533_s8 = inlined_call_operand.hbm [shape: f32[1,32], index: 8, kind: input, shape index: {}]   ;;  %s3534_s9 = inlined_call_operand.hbm [shape: bf16[32,32], index: 9, kind: input, shape index: {}]   ;;  %s3535_s10 = inlined_call_operand.hbm [shape: f32[1,32], index: 10, kind: input, shape index: {}]   ;;  %s3536_s11 = inlined_call_operand.vmem [shape: bf16[32,128], index: 11, kind: input, shape index: {}]   ;;  %s3537_s12 = inlined_call_operand.vmem [shape: f32[1,128], index: 12, kind: input, shape index: {}]   ;;  %s3538_s13 = inlined_call_operand.hbm [shape: f32[8,128], index: 13, kind: output, shape index: {}]  }
   0x1   :  { %19 = vsyncpa [#allocation6], 0 }
   0x2   :  { %20 = vsyncpa [#allocation9], 0 }
   0x3   :  { %21 = vsyncpa [#allocation12], 0 }
   0x4   :  { %22 = vsyncpa [#allocation4], 0  ;;  %s2641_s25 = smov [#allocation5]   ;;  %s2642_s27 = smov [#allocation8]  }
   0x5   :  { %s47_s26 = sshll.u32 %s2641_s25, 4  ;;  %s71_s28 = sshll.u32 %s2642_s27, 4  ;;  %s48_s26 = int_to_ptr.vmem [resolvable:$true] %s47_s26  ;;  %s72_s28 = int_to_ptr.vmem [resolvable:$true] %s71_s28 }
   0x6   :  { %s2477_s14 = scalar_lea.hbm %s3529_s4, 64 }
   0x7   :  { %p2478_p0 = scmp.ne.s32.totalorder %s3529_s4, %s2477_s14  ;;  %p2481_p1 = scmp.lt.u32.totalorder %s2477_s14, %s3529_s4 }
   0x9   :  { %p2483_p2 = pnand %p2481_p1, %p2478_p0 }
   0xb   :  { %2486 = shalt.err (!%p2483_p2)
}
   0xc   :  { %s2487_s19 = scalar_lea.vmem %s48_s26, 64  ;;  %p2492_p4 = scmp.lt.s32.totalorder %s48_s26, %s48_s26 }
   0xd   :  { %p2488_p3 = scmp.ne.s32.totalorder %s48_s26, %s2487_s19  ;;  %p2493_p5 = scmp.lt.s32.totalorder %s2487_s19, %s2487_s19 }
   0xf   :  { %p2494_p6 = por %p2493_p5, %p2492_p4 }
  0x11   :  { %p2495_p7 = pnand %p2494_p6, %p2488_p3 }
  0x13   :  { %2498 = shalt.err (!%p2495_p7)
}
  0x14   :  { %50 = dma.hbm_to_vmem [thread:$0]  %s3529_s4, 64, %s48_s26, [#allocation6]  }
  0x15   :  { %s2499_s24 = scalar_lea.hbm %s3533_s8, 16 }
  0x16   :  { %p2500_p8 = scmp.ne.s32.totalorder %s3533_s8, %s2499_s24  ;;  %p2503_p9 = scmp.lt.u32.totalorder %s2499_s24, %s3533_s8 }
  0x18   :  { %p2505_p10 = pnand %p2503_p9, %p2500_p8 }
  0x1a   :  { %2508 = shalt.err (!%p2505_p10)
}
  0x1b   :  { %s2509_s14 = scalar_lea.vmem %s72_s28, 16  ;;  %s2513_s15 = scalar_lea.vmem %s72_s28, 32 }
  0x1c   :  { %p2510_p11 = scmp.ne.s32.totalorder %s72_s28, %s2509_s14  ;;  %p2514_p12 = scmp.lt.s32.totalorder %s72_s28, %s72_s28 }
  0x1d   :  { %p2515_p13 = scmp.lt.s32.totalorder %s2513_s15, %s2509_s14 }
  0x1f   :  { %p2516_p0 = por %p2515_p13, %p2514_p12 }
  0x21   :  { %p2517_p1 = pnand %p2516_p0, %p2510_p11 }
  0x23   :  { %2520 = shalt.err (!%p2517_p1)
}
  0x24   :  { %74 = dma.hbm_to_vmem [thread:$0]  %s3533_s8, 16, %s72_s28, [#allocation9]  }
  0x25   :  { %s2643_s16 = smov [#allocation2]   ;;  %s2521_s20 = scalar_lea.hbm %s3525_s0, 3072 }
  0x26   :  { %s28_s17 = sshll.u32 %s2643_s16, 4  ;;  %p2522_p2 = scmp.ne.s32.totalorder %s3525_s0, %s2521_s20  ;;  %s29_s17 = int_to_ptr.vmem [resolvable:$true] %s28_s17 }
  0x27   :  { %p2525_p3 = scmp.lt.u32.totalorder %s2521_s20, %s3525_s0 }
  0x29   :  { %p2527_p4 = pnand %p2525_p3, %p2522_p2 }
  0x2b   :  { %2530 = shalt.err (!%p2527_p4)
}
  0x2c   :  { %s2531_s25 = scalar_lea.vmem %s29_s17, 3072  ;;  %p2536_p6 = scmp.lt.s32.totalorder %s29_s17, %s29_s17 }
  0x2d   :  { %p2532_p5 = scmp.ne.s32.totalorder %s29_s17, %s2531_s25  ;;  %p2537_p7 = scmp.lt.s32.totalorder %s2531_s25, %s2531_s25 }
  0x2f   :  { %p2538_p8 = por %p2537_p7, %p2536_p6 }
  0x31   :  { %p2539_p9 = pnand %p2538_p8, %p2532_p5 }
  0x33   :  { %2542 = shalt.err (!%p2539_p9)
}
  0x34   :  { %s2644_s8 = smov 128   ;;  %s2645_s28 = smov 8  }
  0x35   :  { %34 = dma.hbm_to_vmem [thread:$0]  %s3525_s0, 3072, %s29_s17, [#allocation3], %s2644_s8, %s2644_s8, %s2645_s28  }
  0x36   :  { %s2646_s30 = smov [#allocation7]   ;;  %s2647_s15 = smov [#allocation10]  }
  0x37   :  { %s59_s14 = sshll.u32 %s2646_s30, 4  ;;  %s80_s4 = sshll.u32 %s2647_s15, 4  ;;  %s60_s14 = int_to_ptr.vmem [resolvable:$true] %s59_s14  ;;  %s81_s4 = int_to_ptr.vmem [resolvable:$true] %s80_s4 }
  0x38   :  { %s2543_s18 = scalar_lea.hbm %s3531_s6, 16 }
  0x39   :  { %p2544_p10 = scmp.ne.s32.totalorder %s3531_s6, %s2543_s18  ;;  %p2547_p11 = scmp.lt.u32.totalorder %s2543_s18, %s3531_s6 }
  0x3b   :  { %p2549_p12 = pnand %p2547_p11, %p2544_p10 }
  0x3d   :  { %2552 = shalt.err (!%p2549_p12)
}
  0x3e   :  { %s2553_s0 = scalar_lea.vmem %s60_s14, 16  ;;  %s2557_s17 = scalar_lea.vmem %s60_s14, 32 }
  0x3f   :  { %p2554_p13 = scmp.ne.s32.totalorder %s60_s14, %s2553_s0  ;;  %p2558_p0 = scmp.lt.s32.totalorder %s60_s14, %s60_s14 }
  0x40   :  { %p2559_p1 = scmp.lt.s32.totalorder %s2557_s17, %s2553_s0 }
  0x42   :  { %p2560_p2 = por %p2559_p1, %p2558_p0 }
  0x44   :  { %p2561_p3 = pnand %p2560_p2, %p2554_p13 }
  0x46   :  { %2564 = shalt.err (!%p2561_p3)
}
  0x47   :  { %62 = dma.hbm_to_vmem [thread:$0]  %s3531_s6, 16, %s60_s14, [#allocation6]  }
  0x48   :  { %s2565_s28 = scalar_lea.hbm %s3534_s9, 256 }
  0x49   :  { %p2566_p4 = scmp.ne.s32.totalorder %s3534_s9, %s2565_s28  ;;  %p2569_p5 = scmp.lt.u32.totalorder %s2565_s28, %s3534_s9 }
  0x4b   :  { %p2571_p6 = pnand %p2569_p5, %p2566_p4 }
  0x4d   :  { %2574 = shalt.err (!%p2571_p6)
}
  0x4e   :  { %s2575_s26 = scalar_lea.vmem %s81_s4, 256  ;;  %p2580_p8 = scmp.lt.s32.totalorder %s81_s4, %s81_s4 }
  0x4f   :  { %p2576_p7 = scmp.ne.s32.totalorder %s81_s4, %s2575_s26  ;;  %p2581_p9 = scmp.lt.s32.totalorder %s2575_s26, %s2575_s26 }
  0x51   :  { %p2582_p10 = por %p2581_p9, %p2580_p8 }
  0x53   :  { %p2583_p11 = pnand %p2582_p10, %p2576_p7 }
  0x55   :  { %2586 = shalt.err (!%p2583_p11)
}
  0x56   :  { %s2648_s6 = smov 64   ;;  %s2649_s14 = smov 4  }
  0x57   :  { %86 = dma.hbm_to_vmem [thread:$0]  %s3534_s9, 256, %s81_s4, [#allocation9], %s2648_s6, %s2648_s6, %s2649_s14  }
  0x58   :  { %s2650_s19 = smov [#allocation11]   ;;  %s2587_s0 = scalar_lea.hbm %s3535_s10, 16 }
  0x59   :  { %s93_s20 = sshll.u32 %s2650_s19, 4  ;;  %p2588_p12 = scmp.ne.s32.totalorder %s3535_s10, %s2587_s0  ;;  %s94_s20 = int_to_ptr.vmem [resolvable:$true] %s93_s20 }
  0x5a   :  { %p2591_p13 = scmp.lt.u32.totalorder %s2587_s0, %s3535_s10 }
  0x5c   :  { %p2593_p0 = pnand %p2591_p13, %p2588_p12 }
  0x5e   :  { %2596 = shalt.err (!%p2593_p0)
}
  0x5f   :  { %s2597_s8 = scalar_lea.vmem %s94_s20, 16  ;;  %s2601_s9 = scalar_lea.vmem %s94_s20, 32 }
  0x60   :  { %p2598_p1 = scmp.ne.s32.totalorder %s94_s20, %s2597_s8  ;;  %p2602_p2 = scmp.lt.s32.totalorder %s94_s20, %s94_s20 }
  0x61   :  { %p2603_p3 = scmp.lt.s32.totalorder %s2601_s9, %s2597_s8 }
  0x63   :  { %p2604_p4 = por %p2603_p3, %p2602_p2 }
  0x65   :  { %p2605_p5 = pnand %p2604_p4, %p2598_p1 }
  0x67   :  { %2608 = shalt.err (!%p2605_p5)
}
  0x68   :  { %96 = dma.hbm_to_vmem [thread:$0]  %s3535_s10, 16, %s94_s20, [#allocation12]  }
  0x69   :  { %2631 = dma.done.wait [#allocation3], 3072  }
  0x6a   :  { %2632 = vsyncadd [#allocation3], 4294964224 }
  0x6b   :  { %2633 = dma.done.wait [#allocation6], 80  }
  0x6c   :  { %2634 = vsyncadd [#allocation6], 4294967216 }
  0x6d   :  { %2635 = dma.done.wait [#allocation9], 272  }
  0x6e   :  { %2636 = vsyncadd [#allocation9], 4294967024 }
  0x6f   :  { %2637 = dma.done.wait [#allocation12], 16  }
  0x70   :  { %2638 = vsyncadd [#allocation12], 4294967280  ;;  %v241_v0 = vlaneseq  ;;  %v2651_v1 = vmov 0.0   ;;  %vm2652_vm0 = vmmov 0   ;;  %vm144_vm1 = vcmask 261120   ;;  %v2405_v3 = vld [vmem:[%s3532_s7] sm:$0xff]  }
  0x71   :  { %2229 = vmatprep.subr.bf16.mxu0 %v2651_v1  ;;  %2233 = vmatprep.mubr.msk.bf16.mxu0 %vm2652_vm0, %v2651_v1  ;;  %v2406_v5 = vld [vmem:[%s3532_s7 + $0x8] sm:$0xff]   ;;  %v120_v6 = vld [vmem:[#allocation2] sm:$0xff]  ;;  %v122_v8 = vld [vmem:[#allocation2 + $0x10] sm:$0xff]  ;;  %vm436_vm3 = vcmask 1041409   ;;  %vm439_vm4 = vcmask 1042434   ;;  %vm442_vm5 = vcmask 1043459  }
  0x72   :  { %v2800_v2 = vshrl.u32 %v241_v0, 7  ;;  %2237 = vmatprep.subr.bf16.mxu1 %v2405_v3  ;;  %v121_v7 = vld [vmem:[#allocation2 + $0x8] sm:$0xff]  ;;  %v145_v9 = vsel %vm144_vm1, %v120_v6, 0.0  ;;  %v148_v11 = vsel %vm144_vm1, %v122_v8, 0.0  ;;  %v2817_v12 = vld [vmem:[%s3527_s2] sm:$0xff]  ;;  %v123_v14 = vld [vmem:[#allocation2 + $0x18] sm:$0xff] }
  0x73   :  { %2238 = vmatpush3.bf16.msra.mxu1 %v2405_v3  ;;  %v146_v10 = vsel %vm144_vm1, %v121_v7, 0.0  ;;  %v2822_v13 = vld [vmem:[%s3527_s2 + $0x8] sm:$0xff]  ;;  %v124_v16 = vld [vmem:[#allocation2 + $0x20] sm:$0xff]  ;;  %v156_v18 = vsel %vm144_vm1, %v123_v14, 0.0  ;;  %v2827_v19 = vadd.f32 %v2817_v12, %v120_v6  ;;  %v2834_v22 = vld [vmem:[%s3527_s2 + $0x10] sm:$0xff]  ;;  %v2843_v27 = vadd.f32 %v2817_v12, %v123_v14  ;;  %s2654_s27 = smov [#allocation13]  }
  0x74   :  { %v2806_v4 = vadd.s32 16, %v2800_v2  ;;  %2239 = vmatprep.subr.bf16.mxu1 %v2406_v5  ;;  %v147_v15 = vadd.f32 %v146_v10, %v145_v9  ;;  %v125_v17 = vld [vmem:[#allocation2 + $0x28] sm:$0xff]  ;;  %v157_v20 = vsel %vm144_vm1, %v124_v16, 0.0  ;;  %v2407_v23 = vld [vmem:[%s3530_s5] sm:$0xff]   ;;  %v2840_v25 = vadd.f32 %v2822_v13, %v121_v7  ;;  %v126_v33 = vld [vmem:[#allocation2 + $0x30] sm:$0xff]  ;;  %s2032_s29 = sshll.u32 %s2654_s27, 4  ;;  %s2033_s29 = int_to_ptr.vmem [resolvable:$true] %s2032_s29 }
  0x75   :  { %v159_v21 = vsel %vm144_vm1, %v125_v17, 0.0  ;;  %v158_v26 = vadd.f32 %v157_v20, %v156_v18  ;;  %v2849_v29 = vadd.f32 %v2834_v22, %v122_v8  ;;  %2230 = vmatpush3.bf16.msra.mxu0 %v2407_v23  ;;  %v2408_v30 = vld [vmem:[%s3530_s5 + $0x8] sm:$0xff]   ;;  %v2855_v31 = vadd.f32 %v2822_v13, %v124_v16  ;;  %v127_v34 = vld [vmem:[#allocation2 + $0x38] sm:$0xff]  ;;  %v2861_v37 = vld [vmem:[#allocation2 + $0x40] sm:$0xff]  ;;  %s2609_s30 = scalar_lea.vmem %s2033_s29, 128  ;;  %p2614_p7 = scmp.lt.s32.totalorder %s2033_s29, %s2033_s29 }
  0x76   :  { %vm247_vm2 = vcmp.eq.s32.totalorder %v2806_v4, 16  ;;  %v149_v24 = vadd.f32 %v148_v11, %v147_v15  ;;  %v2858_v32 = vadd.f32 %v2834_v22, %v125_v17  ;;  %2231 = vmatprep.subr.bf16.mxu0 %v2651_v1  ;;  %v167_v38 = vsel %vm144_vm1, %v126_v33, 0.0  ;;  %v2865_v40 = vld [vmem:[#allocation2 + $0x48] sm:$0xff]  ;;  %v2867_v41 = vld [vmem:[#allocation2 + $0x50] sm:$0xff]  ;;  %v2877_v46 = vld [vmem:[#allocation2 + $0x58] sm:$0xff]  ;;  %p2610_p6 = scmp.ne.s32.totalorder %s2033_s29, %s2609_s30  ;;  %p2615_p8 = scmp.lt.s32.totalorder %s2609_s30, %s2609_s30 }
  0x77   :  { %2240 = vmatpush3.bf16.msra.mxu1 %v2406_v5  ;;  %v2846_v28 = vsel %vm247_vm2, 1.0, %v2651_v1  ;;  %v160_v36 = vadd.f32 %v159_v21, %v158_v26  ;;  %v168_v39 = vsel %vm144_vm1, %v127_v34, 0.0  ;;  %v170_v43 = vsel %vm144_vm1, %v2861_v37, 0.0  ;;  %v2879_v47 = vld [vmem:[#allocation2 + $0x60] sm:$0xff]  ;;  %v2881_v48 = vld [vmem:[#allocation2 + $0x68] sm:$0xff]  ;;  %v2883_v51 = vld [vmem:[#allocation2 + $0x70] sm:$0xff] }
  0x78   :  { %v150_v35 = vrot.slane %v149_v24, 4  ;;  %v169_v42 = vadd.f32 %v168_v39, %v167_v38  ;;  %v2872_v44 = vadd.f32 %v2817_v12, %v126_v33  ;;  %v2875_v45 = vadd.f32 %v2822_v13, %v127_v34  ;;  %v2885_v52 = vld [vmem:[#allocation2 + $0x78] sm:$0xff]  ;;  %v2891_v56 = vld [vmem:[#allocation2 + $0x80] sm:$0xff]  ;;  %v2893_v57 = vld [vmem:[#allocation2 + $0x88] sm:$0xff]  ;;  %p2616_p9 = por %p2615_p8, %p2614_p7 }
  0x79   :  { %v161_v50 = vrot.slane %v160_v36, 4  ;;  %v178_v53 = vsel %vm144_vm1, %v2865_v40, 0.0  ;;  %v179_v54 = vsel %vm144_vm1, %v2867_v41, 0.0  ;;  %2232 = vmatpush3.bf16.msra.mxu0 %v2408_v30  ;;  %v181_v59 = vsel %vm144_vm1, %v2877_v46, 0.0  ;;  %v2903_v5 = vld [vmem:[#allocation2 + $0x90] sm:$0xff]  ;;  %v2905_v6 = vld [vmem:[#allocation2 + $0x98] sm:$0xff] }
  0x7a   :  { %v151_v49 = vadd.f32 %v150_v35, %v149_v24  ;;  %v171_v55 = vadd.f32 %v170_v43, %v169_v42  ;;  %v180_v58 = vadd.f32 %v179_v54, %v178_v53  ;;  %v189_v60 = vsel %vm144_vm1, %v2879_v47, 0.0  ;;  %v2913_v17 = vld [vmem:[#allocation2 + $0xa0] sm:$0xff]  ;;  %v2915_v26 = vld [vmem:[#allocation2 + $0xa8] sm:$0xff]  ;;  %p2617_p10 = pnand %p2616_p9, %p2610_p6 }
  0x7b   :  { %v162_v62 = vadd.f32 %v161_v50, %v160_v36  ;;  %v190_v63 = vsel %vm144_vm1, %v2881_v48, 0.0  ;;  %v192_v0 = vsel %vm144_vm1, %v2883_v51, 0.0  ;;  %v200_v9 = vsel %vm144_vm1, %v2885_v52, 0.0 }
  0x7c   :  { %v152_v61 = vrot.slane %v151_v49, 2  ;;  %v172_v3 = vrot.slane %v171_v55, 4  ;;  %v182_v7 = vadd.f32 %v181_v59, %v180_v58  ;;  %v191_v8 = vadd.f32 %v190_v63, %v189_v60 }
  0x7d   :  { %v163_v11 = vrot.slane %v162_v62, 2  ;;  %v201_v14 = vsel %vm144_vm1, %v2891_v56, 0.0  ;;  %v203_v15 = vsel %vm144_vm1, %v2893_v57, 0.0  ;;  %v211_v30 = vsel %vm144_vm1, %v2903_v5, 0.0 }
  0x7e   :  { %v153_v10 = vadd.f32 %v152_v61, %v151_v49  ;;  %v173_v16 = vadd.f32 %v172_v3, %v171_v55  ;;  %v183_v18 = vrot.slane %v182_v7, 4  ;;  %v193_v20 = vadd.f32 %v192_v0, %v191_v8 }
  0x7f   :  { %v202_v21 = vadd.f32 %v201_v14, %v200_v9  ;;  %v164_v24 = vadd.f32 %v163_v11, %v162_v62  ;;  %v212_v33 = vsel %vm144_vm1, %v2905_v6, 0.0  ;;  %v214_v49 = vsel %vm144_vm1, %v2913_v17, 0.0  ;;  %v2928_v62 = vld [vmem:[%s3526_s1] ss:$0 sm:$0xff] }
  0x80   :  { %v154_v23 = vrot.slane %v153_v10, 1  ;;  %v174_v34 = vrot.slane %v173_v16, 2  ;;  %v184_v35 = vadd.f32 %v183_v18, %v182_v7  ;;  %v194_v36 = vrot.slane %v193_v20, 4 }
  0x81   :  { %v204_v38 = vadd.f32 %v203_v15, %v202_v21  ;;  %v165_v42 = vrot.slane %v164_v24, 1  ;;  %v213_v43 = vadd.f32 %v212_v33, %v211_v30  ;;  %v222_v61 = vsel %vm144_vm1, %v2915_v26, 0.0 }
  0x82   :  { %v155_v39 = vadd.f32 %v154_v23, %v153_v10  ;;  %v175_v50 = vadd.f32 %v174_v34, %v173_v16  ;;  %v185_v53 = vrot.slane %v184_v35, 2  ;;  %v195_v54 = vadd.f32 %v194_v36, %v193_v20 }
  0x83   :  { %v205_v55 = vrot.slane %v204_v38, 4  ;;  %v166_v59 = vadd.f32 %v165_v42, %v164_v24  ;;  %v215_v60 = vadd.f32 %v214_v49, %v213_v43  ;;  %vm445_vm6 = vcmask 1044484  }
  0x84   :  { %v233_v58 = vmul.f32 0.0625, %v155_v39  ;;  %v176_v63 = vrot.slane %v175_v50, 1  ;;  %v186_v0 = vadd.f32 %v185_v53, %v184_v35  ;;  %v196_v3 = vrot.slane %v195_v54, 2 }
  0x85   :  { %v206_v7 = vadd.f32 %v205_v55, %v204_v38  ;;  %v234_v10 = vmul.f32 0.0625, %v166_v59  ;;  %v2949_v59 = vld [vmem:[#allocation2 + $0xb0] sm:$0xff]  ;;  %vm448_vm7 = vcmask 1045509   ;;  %vm451_vm8 = vcmask 1046534  }
  0x86   :  { %v281_v8 = vmul.f32 0.0, %v233_v58  ;;  %v392_v9 = vadd.f32 %v2928_v62, %v233_v58  ;;  %v283_v11 = vmul.f32 %v2846_v28, %v233_v58  ;;  %v177_v14 = vadd.f32 %v176_v63, %v175_v50 }
  0x87   :  { %v187_v15 = vrot.slane %v186_v0, 1  ;;  %v197_v16 = vadd.f32 %v196_v3, %v195_v54  ;;  %v207_v18 = vrot.slane %v206_v7, 2  ;;  %v284_v24 = vmul.f32 0.0, %v234_v10 }
  0x88   :  { %v305_v20 = vadd.f32 %v281_v8, %v2827_v19  ;;  %v306_v21 = vadd.f32 %v281_v8, %v2840_v25  ;;  %v400_v23 = vpack.c.bf16 %v392_v9, %v392_v9  ;;  %v307_v30 = vadd.f32 %v283_v11, %v2849_v29 }
  0x89   :  { %v393_v33 = vadd.f32 %v2928_v62, %v234_v10  ;;  %v286_v34 = vmul.f32 %v2846_v28, %v234_v10  ;;  %v235_v35 = vmul.f32 0.0625, %v177_v14  ;;  %v308_v39 = vadd.f32 %v284_v24, %v2843_v27 }
  0x8a   :  { %v2937_v36 = vpack.c.bf16 %v306_v21, %v305_v20  ;;  %v427_v38 = vunpack.c.l.b16 %v400_v23  ;;  %v309_v42 = vadd.f32 %v284_v24, %v2855_v31  ;;  %v188_v53 = vadd.f32 %v187_v15, %v186_v0 }
  0x8b   :  { %v401_v19 = vpack.c.bf16 %v393_v33, %v393_v33  ;;  %v310_v25 = vadd.f32 %v286_v34, %v2858_v32  ;;  %v287_v43 = vmul.f32 0.0, %v235_v35  ;;  %v394_v49 = vadd.f32 %v2928_v62, %v235_v35  ;;  %v2951_v32 = vld [vmem:[#allocation2 + $0xb8] sm:$0xff] }
  0x8c   :  { %2241 = vmatprep.mubr.msk.bf16.mxu1 %vm144_vm1, %v2937_v36  ;;  %v2945_v29 = vpack.c.bf16 %v308_v39, %v307_v30  ;;  %v331_v50 = vpack.c.bf16 %v309_v42, %v308_v39  ;;  %v198_v54 = vrot.slane %v197_v16, 1  ;;  %v208_v9 = vadd.f32 %v207_v18, %v206_v7 }
  0x8d   :  { %v428_v55 = vunpack.c.l.b16 %v401_v19  ;;  %v332_v58 = vpack.c.bf16 %v310_v25, %v310_v25  ;;  %v311_v27 = vadd.f32 %v287_v43, %v2872_v44  ;;  %v312_v31 = vadd.f32 %v287_v43, %v2875_v45 }
  0x8e   :  { %2242 = vmatmul.mubr.msk.bf16.vlgmr.msra.gmra.mrb[0].mxu1 %vm144_vm1, %v2945_v29  ;;  %v365_v63 = vunpack.c.h.b16 %v331_v50  ;;  %v402_v3 = vpack.c.bf16 %v394_v49, %v394_v49  ;;  %v199_v8 = vadd.f32 %v198_v54, %v197_v16  ;;  %v216_v14 = vrot.slane %v215_v60, 4 }
  0x8f   :  { %v435_v10 = vrot.slane %v428_v55, 7  ;;  %v366_v0 = vunpack.c.l.b16 %v332_v58  ;;  %v2955_v11 = vpack.c.bf16 %v312_v31, %v311_v27  ;;  %v209_v44 = vrot.slane %v208_v9, 1 }
  0x90   :  { %v429_v15 = vunpack.c.l.b16 %v402_v3  ;;  %v223_v45 = vsel %vm144_vm1, %v2949_v59, 0.0  ;;  %v225_v20 = vsel %vm144_vm1, %v2951_v32, 0.0  ;;  %v217_v23 = vadd.f32 %v216_v14, %v215_v60 }
  0x91   :  { %v2961_v21 = vpack.c.b16 %v366_v0, %v365_v63  ;;  %v224_v24 = vadd.f32 %v223_v45, %v222_v61  ;;  %v236_v16 = vmul.f32 0.0625, %v188_v53  ;;  %v210_v18 = vadd.f32 %v209_v44, %v208_v9 }
  0x92   :  { %v438_v7 = vrot.slane %v429_v15, 6  ;;  %v237_v30 = vmul.f32 0.0625, %v199_v8  ;;  %v437_v33 = vsel %vm436_vm3, %v435_v10, %v427_v38  ;;  %v218_v34 = vrot.slane %v217_v23, 2 }
  0x93   :  { %2245 = vmatprep.mubr.msk.bf16.mxu1 %vm144_vm1, %v2961_v21  ;;  %v226_v39 = vadd.f32 %v225_v20, %v224_v24  ;;  %v395_v42 = vadd.f32 %v2928_v62, %v236_v16  ;;  %v265_v19 = vadd.f32 %v2834_v22, %v2861_v37  ;;  %v2969_v60 = vmul.f32 0.0625, %v210_v18 }
  0x94   :  { %v396_v61 = vadd.f32 %v2928_v62, %v237_v30  ;;  %v440_v25 = vsel %vm439_vm4, %v438_v7, %v437_v33  ;;  %v266_v38 = vadd.f32 %v2817_v12, %v2865_v40  ;;  %v219_v43 = vadd.f32 %v218_v34, %v217_v23 }
  0x95   :  { %v227_v49 = vrot.slane %v226_v39, 4  ;;  %v403_v50 = vpack.c.bf16 %v395_v42, %v395_v42  ;;  %v289_v53 = vmul.f32 %v2846_v28, %v235_v35  ;;  %v397_v37 = vadd.f32 %v2928_v62, %v2969_v60 }
  0x96   :  { %2246 = vmatmul.mubr.msk.bf16.gmra.mrb[4].mxu1 %vm144_vm1, %v2955_v11  ;;  %v404_v54 = vpack.c.bf16 %v396_v61, %v396_v61  ;;  %v290_v55 = vmul.f32 0.0, %v236_v16  ;;  %v267_v58 = vadd.f32 %v2822_v13, %v2867_v41  ;;  %v220_v27 = vrot.slane %v219_v43, 1 }
  0x97   :  { %v228_v31 = vadd.f32 %v227_v49, %v226_v39  ;;  %v430_v63 = vunpack.c.l.b16 %v403_v50  ;;  %v313_v40 = vadd.f32 %v289_v53, %v265_v19  ;;  %v405_v3 = vpack.c.bf16 %v397_v37, %v397_v37 }
  0x98   :  { %v431_v8 = vunpack.c.l.b16 %v404_v54  ;;  %v314_v9 = vadd.f32 %v290_v55, %v266_v38  ;;  %v268_v35 = vadd.f32 %v2834_v22, %v2877_v46  ;;  %v221_v10 = vadd.f32 %v220_v27, %v219_v43 }
  0x99   :  { %v229_v0 = vrot.slane %v228_v31, 2  ;;  %v441_v14 = vrot.slane %v430_v63, 5  ;;  %v292_v15 = vmul.f32 %v2846_v28, %v236_v16  ;;  %v432_v44 = vunpack.c.l.b16 %v405_v3 }
  0x9a   :  { %v444_v45 = vrot.slane %v431_v8, 4  ;;  %v2985_v20 = vpack.c.bf16 %v314_v9, %v313_v40  ;;  %v315_v41 = vadd.f32 %v290_v55, %v267_v58  ;;  %v239_v24 = vmul.f32 0.0625, %v221_v10 }
  0x9b   :  { %v230_v23 = vadd.f32 %v229_v0, %v228_v31  ;;  %v443_v7 = vsel %vm442_vm5, %v441_v14, %v440_v25  ;;  %v316_v18 = vadd.f32 %v292_v15, %v268_v35  ;;  %v447_v34 = vrot.slane %v432_v44, 3 }
  0x9c   :  { %v446_v33 = vsel %vm445_vm6, %v444_v45, %v443_v7  ;;  %2249 = vmatprep.mubr.msk.bf16.mxu1 %vm144_vm1, %v2985_v20  ;;  %v335_v46 = vpack.c.bf16 %v315_v41, %v314_v9  ;;  %v269_v16 = vadd.f32 %v2817_v12, %v2879_v47  ;;  %v398_v42 = vadd.f32 %v2928_v62, %v239_v24  ;;  %v978_v41 = vld [vmem:[%s3528_s3] sm:$0xff] }
  0x9d   :  { %v231_v39 = vrot.slane %v230_v23, 1  ;;  %v336_v19 = vpack.c.bf16 %v316_v18, %v316_v18  ;;  %v270_v61 = vadd.f32 %v2822_v13, %v2881_v48  ;;  %v449_v25 = vsel %vm448_vm7, %v447_v34, %v446_v33  ;;  %v979_v33 = vld [vmem:[%s3528_s3 + $0x8] sm:$0xff] }
  0x9e   :  { %v371_v38 = vunpack.c.h.b16 %v335_v46  ;;  %v293_v43 = vmul.f32 0.0, %v237_v30  ;;  %v271_v49 = vadd.f32 %v2834_v22, %v2883_v51  ;;  %v406_v53 = vpack.c.bf16 %v398_v42, %v398_v42 }
  0x9f   :  { %v232_v50 = vadd.f32 %v231_v39, %v230_v23  ;;  %v372_v37 = vunpack.c.l.b16 %v336_v19  ;;  %v272_v47 = vadd.f32 %v2817_v12, %v2885_v52  ;;  %v295_v58 = vmul.f32 %v2846_v28, %v237_v30 }
  0xa0   :  { %v317_v54 = vadd.f32 %v293_v43, %v269_v16  ;;  %v318_v55 = vadd.f32 %v293_v43, %v270_v61  ;;  %v296_v27 = vmul.f32 0.0, %v2969_v60  ;;  %v433_v31 = vunpack.c.l.b16 %v406_v53 }
  0xa1   :  { %v240_v48 = vmul.f32 0.0625, %v232_v50  ;;  %v3003_v63 = vpack.c.b16 %v372_v37, %v371_v38  ;;  %v273_v40 = vadd.f32 %v2822_v13, %v2891_v56  ;;  %v319_v3 = vadd.f32 %v295_v58, %v271_v49 }
  0xa2   :  { %v3007_v51 = vpack.c.bf16 %v318_v55, %v317_v54  ;;  %v320_v8 = vadd.f32 %v296_v27, %v272_v47  ;;  %v274_v52 = vadd.f32 %v2834_v22, %v2893_v57  ;;  %v450_v35 = vrot.slane %v433_v31, 2 }
  0xa3   :  { %v399_v9 = vadd.f32 %v2928_v62, %v240_v48  ;;  %2250 = vmatmul.mubr.msk.bf16.gmra.mrb[8].mxu1 %vm144_vm1, %v3003_v63  ;;  %v298_v30 = vmul.f32 %v2846_v28, %v2969_v60  ;;  %v321_v10 = vadd.f32 %v296_v27, %v273_v40  ;;  %vm454_vm9 = vcmask 1047559  }
  0xa4   :  { %2253 = vmatprep.mubr.msk.bf16.mxu1 %vm144_vm1, %v3007_v51  ;;  %v275_v56 = vadd.f32 %v2817_v12, %v2903_v5  ;;  %v299_v15 = vmul.f32 0.0, %v239_v24  ;;  %v452_v62 = vsel %vm451_vm8, %v450_v35, %v449_v25  ;;  %v3021_v44 = vpack.c.bf16 %v320_v8, %v319_v3 }
  0xa5   :  { %v407_v0 = vpack.c.bf16 %v399_v9, %v399_v9  ;;  %v322_v14 = vadd.f32 %v298_v30, %v274_v52  ;;  %v339_v57 = vpack.c.bf16 %v321_v10, %v320_v8  ;;  %v276_v45 = vadd.f32 %v2822_v13, %v2905_v6  ;;  %v980_v6 = vld [vmem:[%s3528_s3 + $0x10] sm:$0xff] }
  0xa6   :  { %v278_v60 = vadd.f32 %v2817_v12, %v2915_v26  ;;  %v277_v18 = vadd.f32 %v2834_v22, %v2913_v17  ;;  %v981_v12 = vld [vmem:[%s3528_s3 + $0x18] sm:$0xff]  ;;  %v301_v26 = vmul.f32 %v2846_v28, %v239_v24  ;;  %v302_v34 = vmul.f32 0.0, %v240_v48 }
  0xa7   :  { %v434_v23 = vunpack.c.l.b16 %v407_v0  ;;  %v340_v5 = vpack.c.bf16 %v322_v14, %v322_v14  ;;  %v377_v7 = vunpack.c.h.b16 %v339_v57  ;;  %v279_v46 = vadd.f32 %v2822_v13, %v2949_v59  ;;  %v3070_v57 = vld [vmem:[#allocation8] ss:$0 sm:$0xff] }
  0xa8   :  { %v280_v17 = vadd.f32 %v2834_v22, %v2951_v32  ;;  %v323_v42 = vadd.f32 %v299_v15, %v275_v56  ;;  %v304_v19 = vmul.f32 %v2846_v28, %v240_v48  ;;  %v324_v61 = vadd.f32 %v299_v15, %v276_v45  ;;  %v2046_v15 = vld [vmem:[#allocation7] ss:$0 sm:$0xff] }
  0xa9   :  { %v453_v16 = vrot.slane %v434_v23, 1  ;;  %v378_v39 = vunpack.c.l.b16 %v340_v5  ;;  %v326_v25 = vadd.f32 %v302_v34, %v278_v60  ;;  %v2383_v38 = vpack.c.bf16 %v979_v33, %v978_v41 }
  0xaa   :  { %v2387_v43 = vpack.c.bf16 %v981_v12, %v980_v6  ;;  %v327_v13 = vadd.f32 %v302_v34, %v279_v46  ;;  %v328_v59 = vadd.f32 %v304_v19, %v280_v17  ;;  %v325_v22 = vadd.f32 %v301_v26, %v277_v18 }
  0xab   :  { %v455_v49 = vsel %vm454_vm9, %v453_v16, %v452_v62  ;;  %2254 = vmatmul.mubr.msk.bf16.gmra.mrb[12].mxu1 %vm144_vm1, %v3021_v44  ;;  %v3050_v24 = vpack.c.b16 %v378_v39, %v377_v7  ;;  %2384 = vmatprep.subr.bf16.mxu1 %v2383_v38  ;;  %v3055_v28 = vpack.c.bf16 %v324_v61, %v323_v42  ;;  %v2653_v35 = vmov 1966171168  }
  0xac   :  { %v456_v50 = vpack.c.b16 %v455_v49, %v455_v49  ;;  %2386 = vmatpush3.bf16.msra.mxu1 %v2383_v38  ;;  %v343_v32 = vpack.c.bf16 %v327_v13, %v326_v25  ;;  %v344_v53 = vpack.c.bf16 %v328_v59, %v328_v59  ;;  %v3059_v37 = vpack.c.bf16 %v326_v25, %v325_v22 }
  0xad   :  { %2257 = vmatprep.mubr.msk.bf16.mxu1 %vm144_vm1, %v3050_v24  ;;  %2388 = vmatprep.subr.bf16.mxu1 %v2387_v43  ;;  %v867_v30 = vunpack.c.l.s4 %v2653_v35  ;;  %v3075_v18 = vsub.s32 0, %v2800_v2  ;;  %vm1626_vm10 = vcmask 1043456   ;;  %vm1248_vm11 = vcmask 31744  }
  0xae   :  { %2234 = vmatmul.mubr.msk.bf16.vlgmr.msra.gmra.mrb[0].mxu0 %vm144_vm1, %v456_v50  ;;  %v383_v47 = vunpack.c.h.b16 %v343_v32  ;;  %v384_v54 = vunpack.c.l.b16 %v344_v53  ;;  %vm1241_vm12 = vcmp.lt.s32.totalorder %v2806_v4, 17 }
  0xaf   :  { %2269 = vmatprep.mubr.msk.bf16.mxu0 %vm144_vm1, %v2937_v36  ;;  %v868_v0 = vunpack.c.0.s8 %v867_v30 }
  0xb0   :  { %2390 = vmatpush3.bf16.msra.mxu1 %v2387_v43  ;;  %v3066_v55 = vpack.c.b16 %v384_v54, %v383_v47 }
  0xb1   :  { %2375 = vmatprep.subr.bf16.mxu1 %v2651_v1  ;;  %v871_v45 = vsub.s32 %v868_v0, %v2800_v2 }
  0xb3   :  { %2258 = vmatmul.mubr.msk.bf16.gmra.mrb[16].mxu1 %vm144_vm1, %v3055_v28 }
  0xb4   :  { %2261 = vmatprep.mubr.msk.bf16.mxu1 %vm144_vm1, %v3059_v37 }
  0xbb   :  { %2262 = vmatmul.mubr.msk.bf16.gmra.mrb[20].mxu1 %vm144_vm1, %v3066_v55 }
 0x161   :  { %v2243_v58 = vpop.f32.mrb[0].mxu1 }
 0x162   :  { %v617_v36 = vpop.f32.mrb[1].mxu1  ;;  %v626_v5 = vadd.f32 %v2243_v58, %v3070_v57 }
 0x163   :  { %v2244_v27 = vpop.f32.mrb[2].mxu1  ;;  %v618_v6 = vadd.f32 %v3070_v57, %v617_v36 }
 0x164   :  { %v620_v48 = vpop.f32.mrb[3].mxu1  ;;  %v629_v12 = vadd.f32 %v2244_v27, %v3070_v57 }
 0x165   :  { %v621_v34 = vadd.f32 %v3070_v57, %v620_v48 }
 0x169   :  { %v2247_v31 = vpop.f32.mrb[4].mxu1 }
 0x16a   :  { %v633_v40 = vpop.f32.mrb[5].mxu1  ;;  %v642_v46 = vadd.f32 %v2247_v31, %v3070_v57 }
 0x16b   :  { %v2248_v3 = vpop.f32.mrb[6].mxu1  ;;  %v634_v42 = vadd.f32 %v3070_v57, %v633_v40 }
 0x16c   :  { %v636_v8 = vpop.f32.mrb[7].mxu1  ;;  %v645_v19 = vadd.f32 %v2248_v3, %v3070_v57 }
 0x16d   :  { %v637_v2 = vadd.f32 %v3070_v57, %v636_v8 }
 0x176   :  { %v2251_v52 = vpop.f32.mrb[8].mxu1 }
 0x177   :  { %v649_v9 = vpop.f32.mrb[9].mxu1  ;;  %v658_v61 = vadd.f32 %v2251_v52, %v3070_v57 }
 0x178   :  { %v2252_v10 = vpop.f32.mrb[10].mxu1  ;;  %v650_v25 = vadd.f32 %v3070_v57, %v649_v9 }
 0x179   :  { %v652_v56 = vpop.f32.mrb[11].mxu1  ;;  %v661_v38 = vadd.f32 %v2252_v10, %v3070_v57 }
 0x17a   :  { %v653_v59 = vadd.f32 %v3070_v57, %v652_v56 }
 0x17e   :  { %v2255_v14 = vpop.f32.mrb[12].mxu1 }
 0x17f   :  { %v665_v62 = vpop.f32.mrb[13].mxu1  ;;  %v674_v22 = vadd.f32 %v2255_v14, %v3070_v57 }
 0x180   :  { %v2256_v60 = vpop.f32.mrb[14].mxu1  ;;  %v666_v32 = vadd.f32 %v3070_v57, %v665_v62 }
 0x181   :  { %v506_v41 = vpop.f32.mrb[0].mxu0  ;;  %v668_v23 = vpop.f32.mrb[15].mxu1  ;;  %v677_v53 = vadd.f32 %v2256_v60, %v3070_v57 }
 0x182   :  { %v507_v7 = vadd.f32 %v2046_v15, %v506_v41  ;;  %v2235_v33 = vpop.f32.mrb[1].mxu0  ;;  %v669_v47 = vadd.f32 %v3070_v57, %v668_v23 }
 0x183   :  { %v509_v26 = vpop.f32.mrb[2].mxu0 }
 0x184   :  { %v865_v17 = vcombine.high %v507_v7, %v507_v7  ;;  %v872_v16 = vrot.slane %v507_v7, %v871_v45  ;;  %v2236_v39 = vpop.f32.mrb[3].mxu0 }
 0x186   :  { %v879_v43 = vrot.slane %v865_v17, %v871_v45  ;;  %v880_v49 = vcombine.high %v872_v16, %v872_v16  ;;  %v888_v13 = vrot.slane %v872_v16, %v871_v45  ;;  %v2259_v50 = vpop.f32.mrb[16].mxu1 }
 0x187   :  { %v681_v54 = vpop.f32.mrb[17].mxu1  ;;  %v690_v3 = vadd.f32 %v2259_v50, %v3070_v57 }
 0x188   :  { %v881_v58 = vcombine.high %v879_v43, %v879_v43  ;;  %v895_v36 = vrot.slane %v879_v43, %v871_v45  ;;  %v902_v27 = vrot.slane %v880_v49, %v871_v45  ;;  %v910_v48 = vcombine.high %v888_v13, %v888_v13  ;;  %v2260_v31 = vpop.f32.mrb[18].mxu1 }
 0x189   :  { %v917_v40 = vrot.slane %v888_v13, %v3075_v18  ;;  %v682_v8 = vadd.f32 %v3070_v57, %v681_v54  ;;  %v693_v52 = vadd.f32 %v2260_v31, %v3070_v57  ;;  %v684_v9 = vpop.f32.mrb[19].mxu1 }
 0x18a   :  { %v909_v35 = vrot.slane %v881_v58, %v871_v45  ;;  %v911_v30 = vcombine.high %v895_v36, %v895_v36  ;;  %v912_v10 = vcombine.high %v902_v27, %v902_v27  ;;  %v921_v56 = vrot.slane %v902_v27, %v3075_v18 }
 0x18b   :  { %v954_v0 = vmul.f32 %v917_v40, %v618_v6  ;;  %v955_v14 = vmul.f32 %v917_v40, %v621_v34  ;;  %v925_v15 = vrot.slane %v910_v48, %v3075_v18  ;;  %v956_v62 = vmul.f32 %v917_v40, %v626_v5 }
 0x18c   :  { %v957_v60 = vmul.f32 %v921_v56, %v629_v12  ;;  %v958_v41 = vmul.f32 %v921_v56, %v634_v42  ;;  %v959_v23 = vmul.f32 %v921_v56, %v637_v2  ;;  %v929_v7 = vrot.slane %v912_v10, %v3075_v18 }
 0x18d   :  { %v960_v33 = vmul.f32 %v925_v15, %v642_v46  ;;  %v961_v26 = vmul.f32 %v925_v15, %v645_v19  ;;  %v962_v17 = vmul.f32 %v925_v15, %v650_v25  ;;  %2301 = vmatprep.mubr.msk.f32.mxu1 %vm144_vm1, %v954_v0  ;;  %v933_v45 = vrot.slane %v895_v36, %v3075_v18 }
 0x18e   :  { %v964_v16 = vmul.f32 %v929_v7, %v658_v61  ;;  %v965_v39 = vmul.f32 %v929_v7, %v661_v38  ;;  %v963_v43 = vmul.f32 %v929_v7, %v653_v59  ;;  %2302 = vmatmul.mubr.msk.f32.vlgmr.msra.gmra.mrb[24].mxu1 %vm144_vm1, %v955_v14  ;;  %v937_v6 = vrot.slane %v909_v35, %v3075_v18  ;;  %v2263_v5 = vpop.f32.mrb[20].mxu1 }
 0x18f   :  { %2304 = vmatprep.mubr.msk.f32.mxu1 %vm144_vm1, %v956_v62  ;;  %v968_v12 = vmul.f32 %v933_v45, %v674_v22  ;;  %v966_v34 = vmul.f32 %v933_v45, %v666_v32  ;;  %v967_v42 = vmul.f32 %v933_v45, %v669_v47  ;;  %v941_v46 = vrot.slane %v911_v30, %v3075_v18  ;;  %v697_v19 = vpop.f32.mrb[21].mxu1 }
 0x190   :  { %v969_v2 = vmul.f32 %v937_v6, %v677_v53  ;;  %v970_v25 = vmul.f32 %v937_v6, %v682_v8  ;;  %v685_v49 = vadd.f32 %v3070_v57, %v684_v9  ;;  %v706_v61 = vadd.f32 %v2263_v5, %v3070_v57  ;;  %v2264_v38 = vpop.f32.mrb[22].mxu1 }
 0x191   :  { %v972_v13 = vmul.f32 %v941_v46, %v690_v3  ;;  %v973_v59 = vmul.f32 %v941_v46, %v693_v52  ;;  %v913_v50 = vcombine.high %v909_v35, %v909_v35  ;;  %v698_v54 = vadd.f32 %v3070_v57, %v697_v19  ;;  %v700_v58 = vpop.f32.mrb[23].mxu1 }
 0x192   :  { %2305 = vmatmul.mubr.msk.f32.gmra.mrb[26].mxu1 %vm144_vm1, %v957_v60  ;;  %v971_v22 = vmul.f32 %v937_v6, %v685_v49  ;;  %v709_v32 = vadd.f32 %v2264_v38, %v3070_v57  ;;  %v701_v47 = vadd.f32 %v3070_v57, %v700_v58  ;;  %v2409_v57 = vld [vmem:[#allocation10] sm:$0xff]  }
 0x193   :  { %2307 = vmatprep.mubr.msk.f32.mxu1 %vm144_vm1, %v958_v41  ;;  %v945_v53 = vrot.slane %v913_v50, %v3075_v18  ;;  %v974_v36 = vmul.f32 %v941_v46, %v698_v54  ;;  %2265 = vmatprep.subr.bf16.mxu0 %v2409_v57  ;;  %v2410_v18 = vld [vmem:[#allocation10 + $0x8] sm:$0xff]  }
 0x194   :  { %2266 = vmatpush3.bf16.msra.mxu0 %v2409_v57 }
 0x195   :  { %v976_v27 = vmul.f32 %v945_v53, %v706_v61  ;;  %v977_v48 = vmul.f32 %v945_v53, %v709_v32  ;;  %v975_v31 = vmul.f32 %v945_v53, %v701_v47  ;;  %2267 = vmatprep.subr.bf16.mxu0 %v2410_v18 }
 0x196   :  { %2308 = vmatmul.mubr.msk.f32.gmra.mrb[28].mxu1 %vm144_vm1, %v959_v23 }
 0x197   :  { %2310 = vmatprep.mubr.msk.f32.mxu1 %vm144_vm1, %v960_v33 }
 0x198   :  { %2268 = vmatpush3.bf16.msra.mxu0 %v2410_v18 }
 0x19a   :  { %2311 = vmatmul.mubr.msk.f32.gmra.mrb[30].mxu1 %vm144_vm1, %v961_v26 }
 0x19b   :  { %2313 = vmatprep.mubr.msk.f32.mxu1 %vm144_vm1, %v962_v17  ;;  %2270 = vmatmul.mubr.msk.bf16.vlgmr.msra.gmra.mrb[4].mxu0 %vm144_vm1, %v2945_v29  ;;  %v1553_v29 = vld [vmem:[#allocation5] sm:$0xf] }
 0x19c   :  { %2273 = vmatprep.mubr.msk.bf16.mxu0 %vm144_vm1, %v2961_v21  ;;  %2337 = vmatprep.subr.msk.mxu0 %vm1626_vm10, %v1553_v29 }
 0x19d   :  { %2338 = vmatpush3.msk.msra.mxu0 %vm1626_vm10, %v1553_v29 }
 0x19e   :  { %2314 = vmatmul.mubr.msk.f32.gmra.mrb[32].mxu1 %vm144_vm1, %v963_v43 }
 0x19f   :  { %2316 = vmatprep.mubr.msk.f32.mxu1 %vm144_vm1, %v964_v16 }
 0x1a2   :  { %2317 = vmatmul.mubr.msk.f32.gmra.mrb[34].mxu1 %vm144_vm1, %v965_v39 }
 0x1a3   :  { %2319 = vmatprep.mubr.msk.f32.mxu1 %vm144_vm1, %v966_v34  ;;  %2274 = vmatmul.mubr.msk.bf16.gmra.mrb[8].mxu0 %vm144_vm1, %v2955_v11 }
 0x1a4   :  { %2277 = vmatprep.mubr.msk.bf16.mxu0 %vm144_vm1, %v2985_v20 }
 0x1a6   :  { %2320 = vmatmul.mubr.msk.f32.gmra.mrb[36].mxu1 %vm144_vm1, %v967_v42 }
 0x1a7   :  { %2322 = vmatprep.mubr.msk.f32.mxu1 %vm144_vm1, %v968_v12 }
 0x1aa   :  { %2323 = vmatmul.mubr.msk.f32.gmra.mrb[38].mxu1 %vm144_vm1, %v969_v2 }
 0x1ab   :  { %2325 = vmatprep.mubr.msk.f32.mxu1 %vm144_vm1, %v970_v25  ;;  %2278 = vmatmul.mubr.msk.bf16.gmra.mrb[12].mxu0 %vm144_vm1, %v3003_v63 }
 0x1ac   :  { %2281 = vmatprep.mubr.msk.bf16.mxu0 %vm144_vm1, %v3007_v51 }
 0x1ae   :  { %2326 = vmatmul.mubr.msk.f32.gmra.mrb[40].mxu1 %vm144_vm1, %v971_v22 }
 0x1af   :  { %2328 = vmatprep.mubr.msk.f32.mxu1 %vm144_vm1, %v972_v13 }
 0x1b2   :  { %2329 = vmatmul.mubr.msk.f32.gmra.mrb[42].mxu1 %vm144_vm1, %v973_v59 }
 0x1b3   :  { %2331 = vmatprep.mubr.msk.f32.mxu1 %vm144_vm1, %v974_v36  ;;  %2282 = vmatmul.mubr.msk.bf16.gmra.mrb[16].mxu0 %vm144_vm1, %v3021_v44 }
 0x1b4   :  { %2285 = vmatprep.mubr.msk.bf16.mxu0 %vm144_vm1, %v3050_v24 }
 0x1b6   :  { %2332 = vmatmul.mubr.msk.f32.gmra.mrb[44].mxu1 %vm144_vm1, %v975_v31 }
 0x1b7   :  { %2334 = vmatprep.mubr.msk.f32.mxu1 %vm144_vm1, %v976_v27 }
 0x1ba   :  { %2335 = vmatmul.mubr.msk.f32.gmra.mrb[46].mxu1 %vm144_vm1, %v977_v48 }
 0x1bb   :  { %2379 = vmatprep.mubr.msk.bf16.mxu1 %vm2652_vm0, %v2651_v1  ;;  %2286 = vmatmul.mubr.msk.bf16.gmra.mrb[20].mxu0 %vm144_vm1, %v3055_v28 }
 0x1bc   :  { %2289 = vmatprep.mubr.msk.bf16.mxu0 %vm144_vm1, %v3059_v37 }
 0x1c3   :  { %2290 = vmatmul.mubr.msk.bf16.gmra.mrb[24].mxu0 %vm144_vm1, %v3066_v55 }
 0x261   :  { %v2303_v11 = vpop.f32.mrb[24].mxu1 }
 0x262   :  { %v1250_v21 = vsel %vm1248_vm11, %v2303_v11, -inf  ;;  %v1120_v20 = vpop.f32.mrb[25].mxu1 }
 0x263   :  { %v1249_v63 = vsel %vm1248_vm11, %v1120_v20, -inf }
 0x264   :  { %v1251_v51 = vmax.f32 %v1249_v63, %v1250_v21 }
 0x265   :  { %v3158_v44 = vpop.f32.mrb[26].mxu1 }
 0x266   :  { %v1130_v24 = vpop.f32.mrb[27].mxu1  ;;  %v1260_v8 = vsel %vm1248_vm11, %v3158_v44, -inf }
 0x267   :  { %v1252_v28 = vsel %vm1248_vm11, %v1130_v24, -inf }
 0x268   :  { %v1253_v37 = vmax.f32 %v1251_v51, %v1252_v28 }
 0x269   :  { %v3161_v40 = vpop.f32.mrb[28].mxu1 }
 0x26a   :  { %v1254_v55 = vrot.slane %v1253_v37, 4  ;;  %v1140_v3 = vpop.f32.mrb[29].mxu1  ;;  %v1263_v30 = vsel %vm1248_vm11, %v3161_v40, -inf }
 0x26b   :  { %v1261_v52 = vsel %vm1248_vm11, %v1140_v3, -inf }
 0x26c   :  { %v1255_v9 = vmax.f32 %v1253_v37, %v1254_v55  ;;  %v1262_v35 = vmax.f32 %v1260_v8, %v1261_v52 }
 0x26d   :  { %v3168_v10 = vpop.f32.mrb[30].mxu1 }
 0x26e   :  { %v1256_v56 = vrot.slane %v1255_v9, 2  ;;  %v1264_v0 = vmax.f32 %v1262_v35, %v1263_v30  ;;  %v1272_v14 = vsel %vm1248_vm11, %v3168_v10, -inf  ;;  %v3172_v15 = vpop.f32.mrb[31].mxu1 }
 0x26f   :  { %v1271_v62 = vsel %vm1248_vm11, %v3172_v15, -inf }
 0x270   :  { %v1257_v60 = vmax.f32 %v1255_v9, %v1256_v56  ;;  %v1265_v41 = vrot.slane %v1264_v0, 4  ;;  %v1273_v23 = vmax.f32 %v1271_v62, %v1272_v14 }
 0x271   :  { %v3176_v7 = vpop.f32.mrb[32].mxu1 }
 0x272   :  { %v1258_v33 = vrot.slane %v1257_v60, 1  ;;  %v1266_v26 = vmax.f32 %v1264_v0, %v1265_v41  ;;  %v3178_v17 = vpop.f32.mrb[33].mxu1  ;;  %v1282_v19 = vsel %vm1248_vm11, %v3176_v7, -inf }
 0x273   :  { %v1274_v45 = vsel %vm1248_vm11, %v3178_v17, -inf }
 0x274   :  { %v1259_v16 = vmax.f32 %v1257_v60, %v1258_v33  ;;  %v1267_v39 = vrot.slane %v1266_v26, 2  ;;  %v1275_v43 = vmax.f32 %v1273_v23, %v1274_v45 }
 0x275   :  { %v3182_v6 = vpop.f32.mrb[34].mxu1 }
 0x276   :  { %v1337_v5 = vsub.f32 %v1120_v20, %v1259_v16  ;;  %v1338_v12 = vsub.f32 %v2303_v11, %v1259_v16  ;;  %v1339_v34 = vsub.f32 %v1130_v24, %v1259_v16  ;;  %v1268_v42 = vmax.f32 %v1266_v26, %v1267_v39  ;;  %v3184_v46 = vpop.f32.mrb[35].mxu1 }
 0x277   :  { %v1276_v2 = vrot.slane %v1275_v43, 4  ;;  %v1283_v25 = vsel %vm1248_vm11, %v3184_v46, -inf  ;;  %v1285_v54 = vsel %vm1248_vm11, %v3182_v6, -inf }
 0x278   :  { %v1361_v49 = vmul.f32 1.442695, %v1337_v5  ;;  %v1363_v61 = vmul.f32 1.442695, %v1338_v12  ;;  %v1365_v38 = vmul.f32 1.442695, %v1339_v34  ;;  %v1284_v13 = vmax.f32 %v1282_v19, %v1283_v25 }
 0x279   :  { %v1269_v59 = vrot.slane %v1268_v42, 1  ;;  %v1277_v50 = vmax.f32 %v1275_v43, %v1276_v2  ;;  %v3192_v58 = vpop.f32.mrb[36].mxu1 }
 0x27a   :  { %2413 = vpow2.f32 %v1361_v49  ;;  %v1286_v22 = vmax.f32 %v1284_v13, %v1285_v54  ;;  %v1294_v32 = vsel %vm1248_vm11, %v3192_v58, -inf  ;;  %v3196_v47 = vpop.f32.mrb[37].mxu1 }
 0x27b   :  { %2415 = vpow2.f32 %v1363_v61  ;;  %v1270_v53 = vmax.f32 %v1268_v42, %v1269_v59  ;;  %v1278_v36 = vrot.slane %v1277_v50, 2  ;;  %v1293_v27 = vsel %vm1248_vm11, %v3196_v47, -inf }
 0x27c   :  { %2417 = vpow2.f32 %v1365_v38  ;;  %v1287_v48 = vrot.slane %v1286_v22, 4  ;;  %v1295_v31 = vmax.f32 %v1293_v27, %v1294_v32 }
 0x27d   :  { %v1340_v57 = vsub.f32 %v3158_v44, %v1270_v53  ;;  %v1341_v18 = vsub.f32 %v1140_v3, %v1270_v53  ;;  %v1342_v29 = vsub.f32 %v3161_v40, %v1270_v53  ;;  %v1279_v11 = vmax.f32 %v1277_v50, %v1278_v36  ;;  %v3202_v21 = vpop.f32.mrb[38].mxu1 }
 0x27e   :  { %v1288_v20 = vmax.f32 %v1286_v22, %v1287_v48  ;;  %v3205_v63 = vpop.f32.mrb[39].mxu1  ;;  %v3212_v40 = vsel %vm1241_vm12, 1.0, %v2651_v1  ;;  %v1304_v35 = vsel %vm1248_vm11, %v3202_v21, -inf }
 0x27f   :  { %v1367_v51 = vmul.f32 1.442695, %v1340_v57  ;;  %v1369_v24 = vmul.f32 1.442695, %v1341_v18  ;;  %v1371_v28 = vmul.f32 1.442695, %v1342_v29 }
 0x280   :  { %v1280_v37 = vrot.slane %v1279_v11, 1  ;;  %v1289_v55 = vrot.slane %v1288_v20, 2  ;;  %v1296_v8 = vsel %vm1248_vm11, %v3205_v63, -inf }
 0x281   :  { %2419 = vpow2.f32 %v1367_v51  ;;  %v1297_v44 = vmax.f32 %v1295_v31, %v1296_v8  ;;  %v3209_v3 = vpop.f32.mrb[40].mxu1 }
 0x282   :  { %2421 = vpow2.f32 %v1369_v24  ;;  %v1281_v4 = vmax.f32 %v1279_v11, %v1280_v37  ;;  %v1290_v52 = vmax.f32 %v1288_v20, %v1289_v55  ;;  %v3214_v9 = vpop.f32.mrb[41].mxu1  ;;  %v1307_v45 = vsel %vm1248_vm11, %v3209_v3, -inf }
 0x283   :  { %2423 = vpow2.f32 %v1371_v28  ;;  %v1298_v30 = vrot.slane %v1297_v44, 4  ;;  %v1305_v56 = vsel %vm1248_vm11, %v3214_v9, -inf }
 0x284   :  { %v3220_v0 = vpop.eup %2413  ;;  %v1343_v14 = vsub.f32 %v3172_v15, %v1281_v4  ;;  %v1344_v62 = vsub.f32 %v3168_v10, %v1281_v4  ;;  %v1345_v60 = vsub.f32 %v3178_v17, %v1281_v4  ;;  %v1291_v41 = vrot.slane %v1290_v52, 1 }
 0x285   :  { %v3225_v23 = vpop.eup %2415  ;;  %v1433_v33 = vsel %vm1248_vm11, %v3220_v0, 0.0  ;;  %v1299_v26 = vmax.f32 %v1297_v44, %v1298_v30  ;;  %v1306_v16 = vmax.f32 %v1304_v35, %v1305_v56  ;;  %v3231_v39 = vpop.f32.mrb[42].mxu1 }
 0x286   :  { %v2418_v43 = vpop.eup %2417  ;;  %v1434_v15 = vsel %vm1248_vm11, %v3225_v23, 0.0  ;;  %v1373_v10 = vmul.f32 1.442695, %v1343_v14  ;;  %v1375_v5 = vmul.f32 1.442695, %v1344_v62  ;;  %v1292_v17 = vmax.f32 %v1290_v52, %v1291_v41  ;;  %v3235_v12 = vpop.f32.mrb[43].mxu1 }
 0x287   :  { %v3238_v34 = vmul.f32 %v2418_v43, %v3212_v40  ;;  %v1435_v42 = vadd.f32 %v1434_v15, %v1433_v33  ;;  %v1377_v19 = vmul.f32 1.442695, %v1345_v60  ;;  %v1300_v2 = vrot.slane %v1299_v26, 2 }
 0x288   :  { %2425 = vpow2.f32 %v1373_v10  ;;  %v1346_v25 = vsub.f32 %v3176_v7, %v1292_v17  ;;  %v1347_v49 = vsub.f32 %v3184_v46, %v1292_v17  ;;  %v1348_v61 = vsub.f32 %v3182_v6, %v1292_v17 }
 0x289   :  { %v1436_v38 = vsel %vm1248_vm11, %v3238_v34, 0.0  ;;  %2427 = vpow2.f32 %v1375_v5  ;;  %v1301_v13 = vmax.f32 %v1299_v26, %v1300_v2  ;;  %v1308_v59 = vmax.f32 %v1306_v16, %v1307_v45  ;;  %v3245_v50 = vpop.f32.mrb[44].mxu1 }
 0x28a   :  { %v1437_v54 = vadd.f32 %v1436_v38, %v1435_v42  ;;  %2429 = vpow2.f32 %v1377_v19  ;;  %v1379_v22 = vmul.f32 1.442695, %v1346_v25  ;;  %v1381_v32 = vmul.f32 1.442695, %v1347_v49  ;;  %v3247_v53 = vpop.f32.mrb[45].mxu1 }
 0x28b   :  { %v3249_v36 = vpop.eup %2419  ;;  %v1383_v7 = vmul.f32 1.442695, %v1348_v61  ;;  %v1302_v46 = vrot.slane %v1301_v13, 1  ;;  %v1309_v27 = vrot.slane %v1308_v59, 4  ;;  %v1316_v6 = vsel %vm1248_vm11, %v3231_v39, -inf }
 0x28c   :  { %v3253_v48 = vpop.eup %2421  ;;  %v1438_v31 = vrot.slane %v1437_v54, 4  ;;  %v1444_v57 = vsel %vm1248_vm11, %v3249_v36, 0.0  ;;  %2431 = vpow2.f32 %v1379_v22  ;;  %v1315_v18 = vsel %vm1248_vm11, %v3235_v12, -inf }
 0x28d   :  { %v2424_v29 = vpop.eup %2423  ;;  %v1445_v11 = vsel %vm1248_vm11, %v3253_v48, 0.0  ;;  %2433 = vpow2.f32 %v1381_v32  ;;  %v1303_v20 = vmax.f32 %v1301_v13, %v1302_v46  ;;  %v1310_v51 = vmax.f32 %v1308_v59, %v1309_v27  ;;  %v3261_v24 = vpop.f32.mrb[46].mxu1 }
 0x28e   :  { %v1439_v28 = vadd.f32 %v1438_v31, %v1437_v54  ;;  %v3264_v37 = vmul.f32 %v2424_v29, %v3212_v40  ;;  %v1446_v55 = vadd.f32 %v1445_v11, %v1444_v57  ;;  %2435 = vpow2.f32 %v1383_v7  ;;  %v3266_v8 = vpop.f32.mrb[47].mxu1 }
 0x28f   :  { %v1349_v44 = vsub.f32 %v3196_v47, %v1303_v20  ;;  %v1350_v4 = vsub.f32 %v3192_v58, %v1303_v20  ;;  %v1351_v52 = vsub.f32 %v3205_v63, %v1303_v20  ;;  %v1311_v35 = vrot.slane %v1310_v51, 2 }
 0x290   :  { %v1440_v30 = vrot.slane %v1439_v28, 2  ;;  %v1447_v56 = vsel %vm1248_vm11, %v3264_v37, 0.0  ;;  %v1317_v14 = vmax.f32 %v1315_v18, %v1316_v6  ;;  %v1326_v62 = vsel %vm1248_vm11, %v3245_v50, -inf }
 0x291   :  { %v1448_v60 = vadd.f32 %v1447_v56, %v1446_v55  ;;  %v1385_v41 = vmul.f32 1.442695, %v1349_v44  ;;  %v1387_v33 = vmul.f32 1.442695, %v1350_v4  ;;  %v1389_v26 = vmul.f32 1.442695, %v1351_v52 }
 0x292   :  { %v3275_v45 = vpop.eup %2425  ;;  %v1441_v47 = vadd.f32 %v1440_v30, %v1439_v28  ;;  %v1312_v16 = vmax.f32 %v1310_v51, %v1311_v35  ;;  %v1318_v58 = vsel %vm1248_vm11, %v3247_v53, -inf  ;;  %v1329_v63 = vsel %vm1248_vm11, %v3261_v24, -inf }
 0x293   :  { %v3281_v43 = vpop.eup %2427  ;;  %v1449_v15 = vrot.slane %v1448_v60, 4  ;;  %v1455_v10 = vsel %vm1248_vm11, %v3275_v45, 0.0  ;;  %2437 = vpow2.f32 %v1385_v41  ;;  %v1319_v5 = vmax.f32 %v1317_v14, %v1318_v58 }
 0x294   :  { %v2430_v17 = vpop.eup %2429  ;;  %v1442_v42 = vrot.slane %v1441_v47, 1  ;;  %v1456_v19 = vsel %vm1248_vm11, %v3281_v43, 0.0  ;;  %2439 = vpow2.f32 %v1387_v33  ;;  %v1313_v2 = vrot.slane %v1312_v16, 1 }
 0x295   :  { %v1450_v25 = vadd.f32 %v1449_v15, %v1448_v60  ;;  %v3288_v49 = vmul.f32 %v2430_v17, %v3212_v40  ;;  %v1457_v61 = vadd.f32 %v1456_v19, %v1455_v10  ;;  %2441 = vpow2.f32 %v1389_v26 }
 0x296   :  { %v3290_v38 = vpop.eup %2431  ;;  %v1443_v13 = vadd.f32 %v1442_v42, %v1441_v47  ;;  %v1314_v59 = vmax.f32 %v1312_v16, %v1313_v2  ;;  %v1320_v54 = vrot.slane %v1319_v5, 4  ;;  %v1327_v22 = vsel %vm1248_vm11, %v3266_v8, -inf }
 0x297   :  { %v3294_v32 = vpop.eup %2433  ;;  %v1451_v7 = vrot.slane %v1450_v25, 2  ;;  %v1458_v46 = vsel %vm1248_vm11, %v3288_v49, 0.0  ;;  %v1466_v27 = vsel %vm1248_vm11, %v3290_v38, 0.0  ;;  %v1328_v6 = vmax.f32 %v1326_v62, %v1327_v22 }
 0x298   :  { %v2436_v31 = vpop.eup %2435  ;;  %2443 = vrcp.f32 %v1443_v13  ;;  %v1459_v57 = vadd.f32 %v1458_v46, %v1457_v61  ;;  %v1467_v18 = vsel %vm1248_vm11, %v3294_v32, 0.0  ;;  %v1352_v29 = vsub.f32 %v3202_v21, %v1314_v59 }
 0x299   :  { %v1452_v11 = vadd.f32 %v1451_v7, %v1450_v25  ;;  %v3304_v20 = vmul.f32 %v2436_v31, %v3212_v40  ;;  %v1468_v51 = vadd.f32 %v1467_v18, %v1466_v27  ;;  %v1353_v28 = vsub.f32 %v3214_v9, %v1314_v59 }
 0x29a   :  { %v1460_v55 = vrot.slane %v1459_v57, 4  ;;  %v1354_v44 = vsub.f32 %v3209_v3, %v1314_v59  ;;  %v1391_v4 = vmul.f32 1.442695, %v1352_v29  ;;  %v1321_v52 = vmax.f32 %v1319_v5, %v1320_v54 }
 0x29b   :  { %v1453_v35 = vrot.slane %v1452_v11, 1  ;;  %v1469_v30 = vsel %vm1248_vm11, %v3304_v20, 0.0  ;;  %v1393_v56 = vmul.f32 1.442695, %v1353_v28  ;;  %v1330_v14 = vmax.f32 %v1328_v6, %v1329_v63 }
 0x29c   :  { %v1461_v62 = vadd.f32 %v1460_v55, %v1459_v57  ;;  %v1470_v21 = vadd.f32 %v1469_v30, %v1468_v51  ;;  %2445 = vpow2.f32 %v1391_v4  ;;  %v1395_v60 = vmul.f32 1.442695, %v1354_v44 }
 0x29d   :  { %v3310_v41 = vpop.eup %2437  ;;  %v1454_v33 = vadd.f32 %v1453_v35, %v1452_v11  ;;  %2447 = vpow2.f32 %v1393_v56  ;;  %v1322_v9 = vrot.slane %v1321_v52, 2  ;;  %v1331_v26 = vrot.slane %v1330_v14, 4 }
 0x29e   :  { %v3312_v47 = vpop.eup %2439  ;;  %v1462_v3 = vrot.slane %v1461_v62, 2  ;;  %v1471_v16 = vrot.slane %v1470_v21, 4  ;;  %v1477_v58 = vsel %vm1248_vm11, %v3310_v41, 0.0  ;;  %2449 = vpow2.f32 %v1395_v60 }
 0x29f   :  { %v2442_v15 = vpop.eup %2441  ;;  %2451 = vrcp.f32 %v1454_v33  ;;  %v1478_v63 = vsel %vm1248_vm11, %v3312_v47, 0.0  ;;  %v1323_v10 = vmax.f32 %v1321_v52, %v1322_v9  ;;  %v1332_v5 = vmax.f32 %v1330_v14, %v1331_v26 }
 0x2a0   :  { %v1463_v17 = vadd.f32 %v1462_v3, %v1461_v62  ;;  %v1472_v42 = vadd.f32 %v1471_v16, %v1470_v21  ;;  %v3319_v19 = vmul.f32 %v2442_v15, %v3212_v40  ;;  %v1479_v2 = vadd.f32 %v1478_v63, %v1477_v58 }
 0x2a1   :  { %v1324_v25 = vrot.slane %v1323_v10, 1  ;;  %v1333_v61 = vrot.slane %v1332_v5, 2 }
 0x2a2   :  { %v2444_v13 = vpop.eup %2443  ;;  %v1464_v59 = vrot.slane %v1463_v17, 1  ;;  %v1473_v54 = vrot.slane %v1472_v42, 2  ;;  %v1480_v22 = vsel %vm1248_vm11, %v3319_v19, 0.0 }
 0x2a3   :  { %v1481_v7 = vadd.f32 %v1480_v22, %v1479_v2  ;;  %v1325_v46 = vmax.f32 %v1323_v10, %v1324_v25  ;;  %v1334_v27 = vmax.f32 %v1332_v5, %v1333_v61  ;;  %v1529_v6 = vmul.f32 %v2444_v13, %v3220_v0 }
 0x2a4   :  { %v1465_v31 = vadd.f32 %v1464_v59, %v1463_v17  ;;  %v1474_v57 = vadd.f32 %v1473_v54, %v1472_v42  ;;  %v1530_v18 = vmul.f32 %v2444_v13, %v3225_v23  ;;  %v1531_v29 = vmul.f32 %v2444_v13, %v3238_v34 }
 0x2a5   :  { %v1482_v11 = vrot.slane %v1481_v7, 4  ;;  %v1355_v51 = vsub.f32 %v3235_v12, %v1325_v46  ;;  %v1356_v28 = vsub.f32 %v3231_v39, %v1325_v46  ;;  %v1357_v55 = vsub.f32 %v3247_v53, %v1325_v46  ;;  %2339 = vmatprep.mubr.msk.f32.mxu0 %vm1248_vm11, %v1529_v6 }
 0x2a6   :  { %v3330_v44 = vpop.eup %2445  ;;  %2453 = vrcp.f32 %v1465_v31  ;;  %v1475_v4 = vrot.slane %v1474_v57, 1  ;;  %v1335_v0 = vrot.slane %v1334_v27, 1  ;;  %2340 = vmatmul.mubr.msk.f32.vlgmr.msra.gmra.mrb[28].mxu0 %vm1248_vm11, %v1530_v18 }
 0x2a7   :  { %v3333_v52 = vpop.eup %2447  ;;  %v1483_v23 = vadd.f32 %v1482_v11, %v1481_v7  ;;  %v1488_v34 = vsel %vm1248_vm11, %v3330_v44, 0.0  ;;  %v1397_v12 = vmul.f32 1.442695, %v1355_v51  ;;  %v1399_v35 = vmul.f32 1.442695, %v1356_v28  ;;  %2342 = vmatprep.mubr.msk.f32.mxu0 %vm1248_vm11, %v1531_v29 }
 0x2a8   :  { %v2450_v39 = vpop.eup %2449  ;;  %v1476_v53 = vadd.f32 %v1475_v4, %v1474_v57  ;;  %v1489_v30 = vsel %vm1248_vm11, %v3333_v52, 0.0  ;;  %v1401_v56 = vmul.f32 1.442695, %v1357_v55  ;;  %v1336_v14 = vmax.f32 %v1334_v27, %v1335_v0 }
 0x2a9   :  { %v2452_v62 = vpop.eup %2451  ;;  %v1484_v21 = vrot.slane %v1483_v23, 2  ;;  %v3341_v60 = vmul.f32 %v2450_v39, %v3212_v40  ;;  %v1490_v33 = vadd.f32 %v1489_v30, %v1488_v34  ;;  %2455 = vpow2.f32 %v1397_v12 }
 0x2aa   :  { %2457 = vrcp.f32 %v1476_v53  ;;  %v1358_v9 = vsub.f32 %v3245_v50, %v1336_v14  ;;  %v1359_v26 = vsub.f32 %v3266_v8, %v1336_v14  ;;  %v1360_v3 = vsub.f32 %v3261_v24, %v1336_v14 }
 0x2ab   :  { %v1485_v16 = vadd.f32 %v1484_v21, %v1483_v23  ;;  %v1491_v58 = vsel %vm1248_vm11, %v3341_v60, 0.0  ;;  %2459 = vpow2.f32 %v1399_v35  ;;  %v1532_v15 = vmul.f32 %v2452_v62, %v3249_v36 }
 0x2ac   :  { %v1492_v63 = vadd.f32 %v1491_v58, %v1490_v33  ;;  %2461 = vpow2.f32 %v1401_v56  ;;  %v1403_v10 = vmul.f32 1.442695, %v1358_v9  ;;  %v1405_v5 = vmul.f32 1.442695, %v1359_v26 }
 0x2ad   :  { %v1486_v17 = vrot.slane %v1485_v16, 1  ;;  %v1407_v42 = vmul.f32 1.442695, %v1360_v3  ;;  %2343 = vmatmul.mubr.msk.f32.gmra.mrb[30].mxu0 %vm1248_vm11, %v1532_v15  ;;  %v1533_v50 = vmul.f32 %v2452_v62, %v3253_v48  ;;  %v1534_v8 = vmul.f32 %v2452_v62, %v3264_v37  ;;  %v2271_v15 = vpop.f32.mrb[4].mxu0 }
 0x2ae   :  { %v1493_v24 = vrot.slane %v1492_v63, 4  ;;  %2463 = vpow2.f32 %v1403_v10  ;;  %v769_v10 = vpop.f32.mrb[5].mxu0 }
 0x2af   :  { %v1487_v2 = vadd.f32 %v1486_v17, %v1485_v16  ;;  %2465 = vpow2.f32 %v1405_v5  ;;  %2345 = vmatprep.mubr.msk.f32.mxu0 %vm1248_vm11, %v1533_v50  ;;  %v2272_v5 = vpop.f32.mrb[6].mxu0 }
 0x2b0   :  { %v2454_v25 = vpop.eup %2453  ;;  %v1494_v36 = vadd.f32 %v1493_v24, %v1492_v63  ;;  %2467 = vpow2.f32 %v1407_v42 }
 0x2b1   :  { %2469 = vrcp.f32 %v1487_v2  ;;  %2346 = vmatmul.mubr.msk.f32.gmra.mrb[32].mxu0 %vm1248_vm11, %v1534_v8  ;;  %v1535_v61 = vmul.f32 %v2454_v25, %v3275_v45  ;;  %v1536_v13 = vmul.f32 %v2454_v25, %v3281_v43  ;;  %v1537_v48 = vmul.f32 %v2454_v25, %v3288_v49 }
 0x2b2   :  { %v1495_v59 = vrot.slane %v1494_v36, 2 }
 0x2b3   :  { %v3357_v37 = vpop.eup %2455  ;;  %2348 = vmatprep.mubr.msk.f32.mxu0 %vm1248_vm11, %v1535_v61 }
 0x2b4   :  { %v2458_v54 = vpop.eup %2457  ;;  %v1496_v22 = vadd.f32 %v1495_v59, %v1494_v36  ;;  %v1499_v7 = vsel %vm1248_vm11, %v3357_v37, 0.0 }
 0x2b5   :  { %v3362_v46 = vpop.eup %2459  ;;  %2349 = vmatmul.mubr.msk.f32.gmra.mrb[34].mxu0 %vm1248_vm11, %v1536_v13  ;;  %v1538_v45 = vmul.f32 %v2458_v54, %v3290_v38  ;;  %v1539_v43 = vmul.f32 %v2458_v54, %v3294_v32  ;;  %v1540_v49 = vmul.f32 %v2458_v54, %v3304_v20 }
 0x2b6   :  { %v2462_v27 = vpop.eup %2461  ;;  %v1497_v6 = vrot.slane %v1496_v22, 1  ;;  %v1500_v31 = vsel %vm1248_vm11, %v3362_v46, 0.0  ;;  %2351 = vmatprep.mubr.msk.f32.mxu0 %vm1248_vm11, %v1537_v48 }
 0x2b7   :  { %v1429_v57 = vmul.f32 %v2462_v27, %v3212_v40  ;;  %v1501_v18 = vadd.f32 %v1500_v31, %v1499_v7 }
 0x2b8   :  { %v2464_v29 = vpop.eup %2463  ;;  %v1498_v11 = vadd.f32 %v1497_v6, %v1496_v22 }
 0x2b9   :  { %v2466_v51 = vpop.eup %2465  ;;  %v1502_v28 = vsel %vm1248_vm11, %v1429_v57, 0.0  ;;  %v1510_v38 = vsel %vm1248_vm11, %v2464_v29, 0.0  ;;  %2352 = vmatmul.mubr.msk.f32.gmra.mrb[36].mxu0 %vm1248_vm11, %v1538_v45 }
 0x2ba   :  { %v2468_v32 = vpop.eup %2467  ;;  %2471 = vrcp.f32 %v1498_v11  ;;  %v1503_v20 = vadd.f32 %v1502_v28, %v1501_v18  ;;  %v1511_v55 = vsel %vm1248_vm11, %v2466_v51, 0.0  ;;  %2354 = vmatprep.mubr.msk.f32.mxu0 %vm1248_vm11, %v1539_v43  ;;  %v2411_v11 = vld [vmem:[%s3536_s11] sm:$0xff]   ;;  %v3437_v28 = vld [vmem:[#allocation11] ss:$0 sm:$0xff] }
 0x2bb   :  { %v2470_v4 = vpop.eup %2469  ;;  %v1432_v0 = vmul.f32 %v2468_v32, %v3212_v40  ;;  %v1512_v23 = vadd.f32 %v1511_v55, %v1510_v38  ;;  %2376 = vmatpush3.bf16.msra.mxu1 %v2411_v11  ;;  %v770_v32 = vadd.f32 %v3437_v28, %v769_v10 }
 0x2bc   :  { %v1504_v34 = vrot.slane %v1503_v20, 4  ;;  %v1541_v12 = vmul.f32 %v2470_v4, %v3310_v41  ;;  %v1542_v35 = vmul.f32 %v2470_v4, %v3312_v47  ;;  %v1543_v39 = vmul.f32 %v2470_v4, %v3319_v19  ;;  %2377 = vmatprep.subr.bf16.mxu1 %v2651_v1 }
 0x2bd   :  { %v1513_v53 = vsel %vm1248_vm11, %v1432_v0, 0.0  ;;  %2355 = vmatmul.mubr.msk.f32.gmra.mrb[38].mxu0 %vm1248_vm11, %v1540_v49 }
 0x2be   :  { %v1505_v30 = vadd.f32 %v1504_v34, %v1503_v20  ;;  %v1514_v56 = vadd.f32 %v1513_v53, %v1512_v23  ;;  %2357 = vmatprep.mubr.msk.f32.mxu0 %vm1248_vm11, %v1541_v12  ;;  %v781_v12 = vadd.f32 %v2272_v5, %v3437_v28 }
 0x2c0   :  { %v1506_v14 = vrot.slane %v1505_v30, 2  ;;  %v1515_v62 = vrot.slane %v1514_v56, 4 }
 0x2c1   :  { %2358 = vmatmul.mubr.msk.f32.gmra.mrb[40].mxu0 %vm1248_vm11, %v1542_v35  ;;  %v778_v35 = vadd.f32 %v2271_v15, %v3437_v28 }
 0x2c2   :  { %v1507_v40 = vadd.f32 %v1506_v14, %v1505_v30  ;;  %v1516_v21 = vadd.f32 %v1515_v62, %v1514_v56  ;;  %2360 = vmatprep.mubr.msk.f32.mxu0 %vm1248_vm11, %v1543_v39 }
 0x2c4   :  { %v2472_v41 = vpop.eup %2471  ;;  %v1508_v47 = vrot.slane %v1507_v40, 1  ;;  %v1517_v33 = vrot.slane %v1516_v21, 2 }
 0x2c5   :  { %v1544_v19 = vmul.f32 %v2472_v41, %v3330_v44  ;;  %v1545_v9 = vmul.f32 %v2472_v41, %v3333_v52  ;;  %v1546_v26 = vmul.f32 %v2472_v41, %v3341_v60  ;;  %v772_v44 = vpop.f32.mrb[7].mxu0 }
 0x2c6   :  { %v1509_v3 = vadd.f32 %v1508_v47, %v1507_v40  ;;  %v1518_v16 = vadd.f32 %v1517_v33, %v1516_v21  ;;  %v3392_v17 = vpop.f32.mrb[8].mxu0  ;;  %v773_v38 = vadd.f32 %v3437_v28, %v772_v44 }
 0x2c7   :  { %2361 = vmatmul.mubr.msk.f32.gmra.mrb[42].mxu0 %vm1248_vm11, %v1544_v19  ;;  %v785_v60 = vpop.f32.mrb[9].mxu0 }
 0x2c8   :  { %2473 = vrcp.f32 %v1509_v3  ;;  %v1519_v58 = vrot.slane %v1518_v16, 1  ;;  %2363 = vmatprep.mubr.msk.f32.mxu0 %vm1248_vm11, %v1545_v9  ;;  %v2276_v24 = vpop.f32.mrb[10].mxu0  ;;  %v786_v62 = vadd.f32 %v3437_v28, %v785_v60  ;;  %v794_v3 = vadd.f32 %v3392_v17, %v3437_v28 }
 0x2c9   :  { %v788_v2 = vpop.f32.mrb[11].mxu0  ;;  %v797_v9 = vadd.f32 %v2276_v24, %v3437_v28 }
 0x2ca   :  { %v1520_v63 = vadd.f32 %v1519_v58, %v1518_v16  ;;  %v3399_v48 = vpop.f32.mrb[12].mxu0  ;;  %v789_v14 = vadd.f32 %v3437_v28, %v788_v2 }
 0x2cb   :  { %2364 = vmatmul.mubr.msk.f32.gmra.mrb[44].mxu0 %vm1248_vm11, %v1546_v26  ;;  %v801_v59 = vpop.f32.mrb[13].mxu0 }
 0x2cc   :  { %2475 = vrcp.f32 %v1520_v63  ;;  %v802_v17 = vadd.f32 %v3437_v28, %v801_v59 }
 0x2d2   :  { %v2474_v52 = vpop.eup %2473 }
 0x2d3   :  { %v1547_v42 = vmul.f32 %v2474_v52, %v3357_v37  ;;  %v1548_v50 = vmul.f32 %v2474_v52, %v3362_v46  ;;  %v1549_v8 = vmul.f32 %v2474_v52, %v1429_v57  ;;  %v3403_v37 = vpop.f32.mrb[14].mxu0 }
 0x2d4   :  { %v804_v54 = vpop.f32.mrb[15].mxu0 }
 0x2d5   :  { %2366 = vmatprep.mubr.msk.f32.mxu0 %vm1248_vm11, %v1547_v42  ;;  %v3406_v22 = vpop.f32.mrb[16].mxu0  ;;  %v805_v42 = vadd.f32 %v3437_v28, %v804_v54 }
 0x2d6   :  { %v2476_v25 = vpop.eup %2475  ;;  %2367 = vmatmul.mubr.msk.f32.gmra.mrb[46].mxu0 %vm1248_vm11, %v1548_v50  ;;  %v3408_v7 = vpop.f32.mrb[17].mxu0 }
 0x2d7   :  { %2369 = vmatprep.mubr.msk.f32.mxu0 %vm1248_vm11, %v1549_v8  ;;  %v1550_v36 = vmul.f32 %v2476_v25, %v2464_v29  ;;  %v1551_v61 = vmul.f32 %v2476_v25, %v2466_v51  ;;  %v1552_v13 = vmul.f32 %v2476_v25, %v1432_v0  ;;  %v3410_v46 = vpop.f32.mrb[18].mxu0  ;;  %v2412_v51 = vld [vmem:[%s3536_s11 + $0x8] sm:$0xff]  }
 0x2d8   :  { %v3412_v45 = vpop.f32.mrb[19].mxu0  ;;  %2378 = vmatpush3.bf16.msra.mxu1 %v2412_v51 }
 0x2d9   :  { %v3414_v43 = vpop.f32.mrb[20].mxu0 }
 0x2da   :  { %2370 = vmatmul.mubr.msk.f32.gmra.mrb[48].mxu0 %vm1248_vm11, %v1550_v36  ;;  %v3416_v49 = vpop.f32.mrb[21].mxu0 }
 0x2db   :  { %2372 = vmatprep.mubr.msk.f32.mxu0 %vm1248_vm11, %v1551_v61  ;;  %v3418_v27 = vpop.f32.mrb[22].mxu0 }
 0x2dc   :  { %v3420_v6 = vpop.f32.mrb[23].mxu0 }
 0x2dd   :  { %v3422_v31 = vpop.f32.mrb[24].mxu0 }
 0x2de   :  { %2373 = vmatmul.mubr.msk.f32.gmra.mrb[50].mxu0 %vm1248_vm11, %v1552_v13  ;;  %v3424_v57 = vpop.f32.mrb[25].mxu0 }
 0x2df   :  { %v3426_v18 = vpop.f32.mrb[26].mxu0 }
 0x2e0   :  { %v3428_v29 = vpop.f32.mrb[27].mxu0 }
 0x379   :  { %v2341_v20 = vpop.f32.mrb[28].mxu0 }
 0x37a   :  { %v1816_v55 = vmul.f32 %v2341_v20, %v773_v38  ;;  %v1696_v4 = vpop.f32.mrb[29].mxu0 }
 0x37b   :  { %v1815_v0 = vmul.f32 %v1696_v4, %v770_v32  ;;  %v813_v32 = vadd.f32 %v3403_v37, %v3437_v28  ;;  %v821_v37 = vadd.f32 %v3437_v28, %v3412_v45  ;;  %v829_v45 = vadd.f32 %v3410_v46, %v3437_v28 }
 0x37c   :  { %v1840_v23 = vsel %vm144_vm1, %v1816_v55, 0.0  ;;  %v810_v55 = vadd.f32 %v3399_v48, %v3437_v28  ;;  %v837_v46 = vadd.f32 %v3437_v28, %v3420_v6 }
 0x37d   :  { %v1839_v34 = vsel %vm144_vm1, %v1815_v0, 0.0 }
 0x37e   :  { %v1841_v1 = vadd.f32 %v1840_v23, %v1839_v34 }
 0x380   :  { %v2344_v39 = vpop.f32.mrb[30].mxu0 }
 0x381   :  { %v1818_v53 = vmul.f32 %v2344_v39, %v781_v12  ;;  %v1706_v30 = vpop.f32.mrb[31].mxu0 }
 0x382   :  { %v1817_v56 = vmul.f32 %v1706_v30, %v778_v35  ;;  %v818_v30 = vadd.f32 %v3437_v28, %v3408_v7 }
 0x383   :  { %v1850_v16 = vsel %vm144_vm1, %v1818_v53, 0.0 }
 0x384   :  { %v1842_v40 = vsel %vm144_vm1, %v1817_v56, 0.0  ;;  %v2347_v21 = vpop.f32.mrb[32].mxu0 }
 0x385   :  { %v1843_v41 = vadd.f32 %v1842_v40, %v1841_v1  ;;  %v1820_v47 = vmul.f32 %v2347_v21, %v789_v14  ;;  %v1716_v33 = vpop.f32.mrb[33].mxu0 }
 0x386   :  { %v1819_v19 = vmul.f32 %v1716_v33, %v786_v62 }
 0x387   :  { %v1844_v26 = vrot.slane %v1843_v41, 4  ;;  %v1853_v52 = vsel %vm144_vm1, %v1820_v47, 0.0 }
 0x388   :  { %v1851_v58 = vsel %vm144_vm1, %v1819_v19, 0.0  ;;  %v2350_v15 = vpop.f32.mrb[34].mxu0 }
 0x389   :  { %v1845_v63 = vadd.f32 %v1844_v26, %v1843_v41  ;;  %v1852_v10 = vadd.f32 %v1851_v58, %v1850_v16  ;;  %v1822_v5 = vmul.f32 %v2350_v15, %v797_v9  ;;  %v1726_v44 = vpop.f32.mrb[35].mxu0 }
 0x38a   :  { %v1821_v60 = vmul.f32 %v1726_v44, %v794_v3  ;;  %v826_v44 = vadd.f32 %v3406_v22, %v3437_v28 }
 0x38b   :  { %v1846_v50 = vrot.slane %v1845_v63, 2  ;;  %v1854_v8 = vadd.f32 %v1853_v52, %v1852_v10  ;;  %v1862_v24 = vsel %vm144_vm1, %v1822_v5, 0.0 }
 0x38c   :  { %v1861_v2 = vsel %vm144_vm1, %v1821_v60, 0.0  ;;  %v2353_v25 = vpop.f32.mrb[36].mxu0 }
 0x38d   :  { %v1847_v36 = vadd.f32 %v1846_v50, %v1845_v63  ;;  %v1855_v61 = vrot.slane %v1854_v8, 4  ;;  %v1863_v13 = vadd.f32 %v1862_v24, %v1861_v2  ;;  %v1824_v11 = vmul.f32 %v2353_v25, %v805_v42  ;;  %v1736_v51 = vpop.f32.mrb[37].mxu0 }
 0x38e   :  { %v1823_v38 = vmul.f32 %v1736_v51, %v802_v17 }
 0x38f   :  { %v1848_v20 = vrot.slane %v1847_v36, 1  ;;  %v1856_v54 = vadd.f32 %v1855_v61, %v1854_v8  ;;  %v1872_v56 = vsel %vm144_vm1, %v1824_v11, 0.0 }
 0x390   :  { %v1864_v4 = vsel %vm144_vm1, %v1823_v38, 0.0  ;;  %v2356_v59 = vpop.f32.mrb[38].mxu0 }
 0x391   :  { %v1857_v0 = vrot.slane %v1856_v54, 2  ;;  %v1865_v23 = vadd.f32 %v1864_v4, %v1863_v13  ;;  %v1826_v34 = vmul.f32 %v2356_v59, %v813_v32  ;;  %v1746_v1 = vpop.f32.mrb[39].mxu0  ;;  %v1849_v12 = vadd.f32 %v1848_v20, %v1847_v36 }
 0x392   :  { %v1825_v35 = vmul.f32 %v1746_v1, %v810_v55  ;;  %v834_v13 = vadd.f32 %v3437_v28, %v3416_v49 }
 0x393   :  { %v1858_v39 = vadd.f32 %v1857_v0, %v1856_v54  ;;  %v1866_v53 = vrot.slane %v1865_v23, 4  ;;  %v1927_v47 = vpack.c.bf16 %v1849_v12, %v1849_v12  ;;  %v1875_v33 = vsel %vm144_vm1, %v1826_v34, 0.0 }
 0x394   :  { %v1873_v48 = vsel %vm144_vm1, %v1825_v35, 0.0  ;;  %v2359_v14 = vpop.f32.mrb[40].mxu0 }
 0x395   :  { %v1859_v62 = vrot.slane %v1858_v39, 1  ;;  %v1867_v40 = vadd.f32 %v1866_v53, %v1865_v23  ;;  %v1874_v21 = vadd.f32 %v1873_v48, %v1872_v56  ;;  %v1756_v41 = vpop.f32.mrb[41].mxu0  ;;  %v1828_v19 = vmul.f32 %v2359_v14, %v821_v37 }
 0x396   :  { %v1827_v9 = vmul.f32 %v1756_v41, %v818_v30  ;;  %v1954_v52 = vunpack.c.l.b16 %v1927_v47  ;;  %v845_v14 = vadd.f32 %v3418_v27, %v3437_v28  ;;  %v850_v27 = vadd.f32 %v3437_v28, %v3424_v57 }
 0x397   :  { %v1860_v26 = vadd.f32 %v1859_v62, %v1858_v39  ;;  %v1868_v3 = vrot.slane %v1867_v40, 2  ;;  %v1876_v7 = vadd.f32 %v1875_v33, %v1874_v21  ;;  %v1884_v16 = vsel %vm144_vm1, %v1828_v19, 0.0 }
 0x398   :  { %v1883_v58 = vsel %vm144_vm1, %v1827_v9, 0.0  ;;  %v842_v62 = vadd.f32 %v3414_v43, %v3437_v28 }
 0x399   :  { %v1928_v15 = vpack.c.bf16 %v1860_v26, %v1860_v26  ;;  %v1869_v63 = vadd.f32 %v1868_v3, %v1867_v40  ;;  %v1877_v10 = vrot.slane %v1876_v7, 4  ;;  %v1885_v5 = vadd.f32 %v1884_v16, %v1883_v58 }
 0x39a   :  { %v2362_v60 = vpop.f32.mrb[42].mxu0 }
 0x39b   :  { %v1955_v42 = vunpack.c.l.b16 %v1928_v15  ;;  %v1870_v50 = vrot.slane %v1869_v63, 1  ;;  %v1878_v8 = vadd.f32 %v1877_v10, %v1876_v7  ;;  %v1830_v24 = vmul.f32 %v2362_v60, %v829_v45  ;;  %v1766_v17 = vpop.f32.mrb[43].mxu0 }
 0x39c   :  { %v1829_v2 = vmul.f32 %v1766_v17, %v826_v44  ;;  %v853_v7 = vadd.f32 %v3437_v28, %v3428_v29  ;;  %v858_v29 = vadd.f32 %v3422_v31, %v3437_v28 }
 0x39d   :  { %v1962_v25 = vsel %vm436_vm3, %v1955_v42, %v1954_v52  ;;  %v1871_v36 = vadd.f32 %v1870_v50, %v1869_v63  ;;  %v1879_v61 = vrot.slane %v1878_v8, 2  ;;  %v1894_v6 = vsel %vm144_vm1, %v1830_v24, 0.0 }
 0x39e   :  { %v1886_v22 = vsel %vm144_vm1, %v1829_v2, 0.0  ;;  %v2365_v11 = vpop.f32.mrb[44].mxu0  ;;  %v861_v42 = vadd.f32 %v3426_v18, %v3437_v28 }
 0x39f   :  { %v1929_v51 = vpack.c.bf16 %v1871_v36, %v1871_v36  ;;  %v1880_v38 = vadd.f32 %v1879_v61, %v1878_v8  ;;  %v1887_v32 = vadd.f32 %v1886_v22, %v1885_v5  ;;  %v1832_v20 = vmul.f32 %v2365_v11, %v837_v46  ;;  %v1776_v54 = vpop.f32.mrb[45].mxu0 }
 0x3a0   :  { %v1831_v55 = vmul.f32 %v1776_v54, %v834_v13 }
 0x3a1   :  { %v1956_v4 = vunpack.c.l.b16 %v1929_v51  ;;  %v1881_v59 = vrot.slane %v1880_v38, 1  ;;  %v1888_v0 = vrot.slane %v1887_v32, 4  ;;  %v1897_v35 = vsel %vm144_vm1, %v1832_v20, 0.0 }
 0x3a2   :  { %v1895_v23 = vsel %vm144_vm1, %v1831_v55, 0.0 }
 0x3a3   :  { %v1963_v34 = vsel %vm439_vm4, %v1956_v4, %v1962_v25  ;;  %v1882_v1 = vadd.f32 %v1881_v59, %v1880_v38  ;;  %v1889_v49 = vadd.f32 %v1888_v0, %v1887_v32  ;;  %v1896_v12 = vadd.f32 %v1895_v23, %v1894_v6 }
 0x3a5   :  { %v1930_v39 = vpack.c.bf16 %v1882_v1, %v1882_v1  ;;  %v1890_v53 = vrot.slane %v1889_v49, 2  ;;  %v1898_v30 = vadd.f32 %v1897_v35, %v1896_v12 }
 0x3a7   :  { %v1957_v37 = vunpack.c.l.b16 %v1930_v39  ;;  %v1891_v56 = vadd.f32 %v1890_v53, %v1889_v49  ;;  %v1899_v48 = vrot.slane %v1898_v30, 4 }
 0x3a9   :  { %v1964_v40 = vsel %vm442_vm5, %v1957_v37, %v1963_v34  ;;  %v1892_v21 = vrot.slane %v1891_v56, 1  ;;  %v1900_v41 = vadd.f32 %v1899_v48, %v1898_v30  ;;  %v2368_v47 = vpop.f32.mrb[46].mxu0  ;;  %v2134_v37 = vld [vmem:[%s3537_s12] ss:$0 sm:$0xff] }
 0x3aa   :  { %v1834_v33 = vmul.f32 %v2368_v47, %v845_v14  ;;  %v1786_v19 = vpop.f32.mrb[47].mxu0 }
 0x3ab   :  { %v1893_v9 = vadd.f32 %v1892_v21, %v1891_v56  ;;  %v1901_v26 = vrot.slane %v1900_v41, 2  ;;  %v1833_v3 = vmul.f32 %v1786_v19, %v842_v62 }
 0x3ac   :  { %v1906_v45 = vsel %vm144_vm1, %v1834_v33, 0.0 }
 0x3ad   :  { %v1931_v16 = vpack.c.bf16 %v1893_v9, %v1893_v9  ;;  %v1902_v43 = vadd.f32 %v1901_v26, %v1900_v41  ;;  %v1905_v58 = vsel %vm144_vm1, %v1833_v3, 0.0  ;;  %v2371_v15 = vpop.f32.mrb[48].mxu0 }
 0x3ae   :  { %v1907_v63 = vadd.f32 %v1906_v45, %v1905_v58  ;;  %v1836_v10 = vmul.f32 %v2371_v15, %v853_v7  ;;  %v1796_v5 = vpop.f32.mrb[49].mxu0 }
 0x3af   :  { %v1958_v44 = vunpack.c.l.b16 %v1931_v16  ;;  %v1903_v52 = vrot.slane %v1902_v43, 1  ;;  %v1835_v60 = vmul.f32 %v1796_v5, %v850_v27 }
 0x3b0   :  { %v1916_v22 = vsel %vm144_vm1, %v1836_v10, 0.0 }
 0x3b1   :  { %v1965_v50 = vsel %vm445_vm6, %v1958_v44, %v1964_v40  ;;  %v1904_v57 = vadd.f32 %v1903_v52, %v1902_v43  ;;  %v1908_v8 = vsel %vm144_vm1, %v1835_v60, 0.0  ;;  %v2374_v24 = vpop.f32.mrb[50].mxu0 }
 0x3b2   :  { %v1909_v17 = vadd.f32 %v1908_v8, %v1907_v63  ;;  %v1838_v2 = vmul.f32 %v2374_v24, %v861_v42  ;;  %v1806_v46 = vpop.f32.mrb[51].mxu0 }
 0x3b3   :  { %v1932_v25 = vpack.c.bf16 %v1904_v57, %v1904_v57  ;;  %v1837_v36 = vmul.f32 %v1806_v46, %v858_v29 }
 0x3b4   :  { %v1910_v61 = vrot.slane %v1909_v17, 4  ;;  %v1919_v28 = vsel %vm144_vm1, %v1838_v2, 0.0 }
 0x3b5   :  { %v1959_v13 = vunpack.c.l.b16 %v1932_v25  ;;  %v1917_v18 = vsel %vm144_vm1, %v1837_v36, 0.0 }
 0x3b6   :  { %v1911_v11 = vadd.f32 %v1910_v61, %v1909_v17  ;;  %v1918_v51 = vadd.f32 %v1917_v18, %v1916_v22 }
 0x3b7   :  { %v1966_v31 = vsel %vm448_vm7, %v1959_v13, %v1965_v50 }
 0x3b8   :  { %v1912_v38 = vrot.slane %v1911_v11, 2  ;;  %v1920_v32 = vadd.f32 %v1919_v28, %v1918_v51 }
 0x3ba   :  { %v1913_v20 = vadd.f32 %v1912_v38, %v1911_v11  ;;  %v1921_v54 = vrot.slane %v1920_v32, 4 }
 0x3bc   :  { %v1914_v55 = vrot.slane %v1913_v20, 1  ;;  %v1922_v4 = vadd.f32 %v1921_v54, %v1920_v32 }
 0x3be   :  { %v1915_v59 = vadd.f32 %v1914_v55, %v1913_v20  ;;  %v1923_v0 = vrot.slane %v1922_v4, 2 }
 0x3c0   :  { %v1933_v6 = vpack.c.bf16 %v1915_v59, %v1915_v59  ;;  %v1924_v23 = vadd.f32 %v1923_v0, %v1922_v4 }
 0x3c2   :  { %v1960_v34 = vunpack.c.l.b16 %v1933_v6  ;;  %v1925_v1 = vrot.slane %v1924_v23, 1 }
 0x3c4   :  { %v1967_v49 = vsel %vm451_vm8, %v1960_v34, %v1966_v31  ;;  %v1926_v12 = vadd.f32 %v1925_v1, %v1924_v23 }
 0x3c6   :  { %v1934_v35 = vpack.c.bf16 %v1926_v12, %v1926_v12 }
 0x3c8   :  { %v1961_v39 = vunpack.c.l.b16 %v1934_v35 }
 0x3ca   :  { %v1968_v53 = vsel %vm454_vm9, %v1961_v39, %v1967_v49 }
 0x3cb   :  { %v1969_v30 = vpack.c.b16 %v1968_v53, %v1968_v53 }
 0x3cd   :  { %2380 = vmatmul.mubr.msk.bf16.vlgmr.msra.gmra.mrb[48].mxu1 %vm144_vm1, %v1969_v30 }
 0x4a0   :  { %v2019_v56 = vpop.f32.mrb[48].mxu1 }
 0x4a1   :  { %v2020_v48 = vadd.f32 %v2134_v37, %v2019_v56  ;;  %v2381_v14 = vpop.f32.mrb[49].mxu1 }
 0x4a2   :  { %v2022_v62 = vpop.f32.mrb[50].mxu1 }
 0x4a3   :  { %2025 = vst [vmem:[#allocation13] sm:$0xff] %v2020_v48  ;;  %v2382_v40 = vpop.f32.mrb[51].mxu1 }
 0x4a4   :  { %2620 = shalt.err (!%p2617_p10)
}
 0x4a5   :  { %s2621_s12 = scalar_lea.hbm %s3538_s13, 128 }
 0x4a6   :  { %p2622_p11 = scmp.ne.s32.totalorder %s3538_s13, %s2621_s12  ;;  %p2625_p12 = scmp.lt.u32.totalorder %s2621_s12, %s3538_s13 }
 0x4a8   :  { %p2627_p13 = pnand %p2625_p12, %p2622_p11 }
 0x4aa   :  { %2630 = shalt.err (!%p2627_p13)
}
 0x4ab   :  { %2035 = dma.vmem_to_hbm [thread:$0]  %s2033_s29, 128, %s3538_s13, [#allocation4]  }
 0x4ac   :  { %2639 = dma.done.wait [#allocation4], 128  }
 0x4ad   :  { %2640 = vsyncadd [#allocation4], 4294967168 }
 0x4ae   :  { %2039 = vsyncpa [#allocation3], 1 }
 0x4af   :  { %2040 = vsyncpa [#allocation6], 1 }
 0x4b0   :  { %2041 = vsyncpa [#allocation9], 1 }
 0x4b1   :  { %2042 = vsyncpa [#allocation12], 1 }
 0x4b2   :  { %2043 = vsyncpa [#allocation4], 1 }

</bundles_post_ra>
